<compile_context>
chip_gen: v7x
topology: tpu7x:2x2x1
jax: 0.10.0
libtpu: 0.0.40
codegen_flags: <defaults>
</compile_context>

<pallas_src>
import functools

import jax
import jax.numpy as jnp
from jax.experimental import pallas as pl
from jax.experimental.pallas import tpu as pltpu


def _round_up(x, m):
    return (x + m - 1) // m * m


# --------------------------------------------------------------------------
# Fused kernel: cutoff distances + self-loop mask + Gaussian-smearing features
# for one (tm, tn) tile of atom pairs.
# --------------------------------------------------------------------------
def _graph_tile_kernel(pos_row_ref, pos_colt_ref, cd_ref, mask_ref, attr_ref,
                       *, r, inv_r, coeff, off_step, n_atoms, self_loop):
    tm, tn = cd_ref.shape
    k_steps = attr_ref.shape[0]
    i = pl.program_id(0)
    j = pl.program_id(1)

    pr = pos_row_ref[...]                          # (tm, 3) row atoms
    pc = pos_colt_ref[...]                         # (3, tn) column atoms (pre-transposed)

    # Pairwise deltas via pure broadcasting -- no in-kernel transposes.
    dx = pr[:, 0:1] - pc[0:1, :]                   # (tm, tn)
    dy = pr[:, 1:2] - pc[1:2, :]
    dz = pr[:, 2:3] - pc[2:3, :]
    d2 = dx * dx + dy * dy + dz * dz
    d = jnp.sqrt(jnp.maximum(d2, 0.0))

    # Global indices of this tile (for padding validity + the diagonal).
    rows = i * tm + jax.lax.broadcasted_iota(jnp.int32, (tm, tn), 0)
    cols = j * tn + jax.lax.broadcasted_iota(jnp.int32, (tm, tn), 1)
    valid = (rows < n_atoms) & (cols < n_atoms)

    # Cutoff mask: keep 0 < d <= r (diagonal self-distances are 0 -> excluded,
    # matching add_selfloop's weight-0 self edges); zero out padded entries.
    within = (d <= r) & (d > 1e-8) & valid
    cd = jnp.where(within, d, jnp.zeros_like(d))
    cd_ref[...] = cd

    # Valid-edge mask (dense analogue of dense_to_sparse + add_selfloop).
    edge = within
    if self_loop:
        edge = edge | ((rows == cols) & valid)
    mask_ref[...] = jnp.where(edge, 1, 0).astype(jnp.int8)

    # Gaussian smearing of the masked, normalized distances, lane-dense layout:
    #   attr[k, a, b] = exp(coeff * (cd[a, b] / r - k * off_step)^2)
    # Offsets are generated in-kernel (iota) -- no extra DMA'd input.
    off = (jax.lax.broadcasted_iota(jnp.int32, (k_steps, tm, tn), 0)
           .astype(jnp.float32) * off_step)
    t = cd[None, :, :] * inv_r - off               # (k_steps, tm, tn), f32 compute
    attr_ref[...] = jnp.exp(coeff * t * t).astype(attr_ref.dtype)


# --------------------------------------------------------------------------
# Wrapper mirroring BaseModel.generate_graph (dense analogue).
# --------------------------------------------------------------------------
def generate_graph(pos, *, r, edge_steps=50, self_loop=True, tile=128):
    """Returns (cd_matrix_masked, edge_weight, edge_attr_t, edge_mask).

    edge_attr_t has the lane-dense transposed layout (edge_steps, N*N):
    edge_attr_t[k, e] == edge_attr[e, k] of the reference implementation.
    Non-edge rows carry the smearing of weight 0; mask with edge_mask downstream.
    """
    n = pos.shape[0]
    n_pad = _round_up(n, tile)
    tm = tn = tile

    pos32 = pos.astype(jnp.float32)
    pos_p = jnp.pad(pos32, ((0, n_pad - n), (0, 0)))   # padded atoms masked via `valid`
    pos_t = pos_p.T                                    # (3, n_pad) tiny wrapper transpose

    coeff = -0.5 / (0.2 ** 2)                          # GaussianSmearing(0, 1, edge_steps, 0.2)
    off_step = 1.0 / float(edge_steps - 1)

    kernel = functools.partial(
        _graph_tile_kernel,
        r=float(r), inv_r=float(1.0 / r), coeff=float(coeff),
        off_step=float(off_step), n_atoms=n, self_loop=bool(self_loop))

    grid = (n_pad // tm, n_pad // tn)
    cd_p, mask_p, attr_p = pl.pallas_call(
        kernel,
        grid=grid,
        in_specs=[
            pl.BlockSpec((tm, 3), lambda i, j: (i, 0)),      # row atom positions
            pl.BlockSpec((3, tn), lambda i, j: (0, j)),      # column atom positions (T)
        ],
        out_specs=[
            pl.BlockSpec((tm, tn), lambda i, j: (i, j)),               # cd tile (f32)
            pl.BlockSpec((tm, tn), lambda i, j: (i, j)),               # edge mask (i8)
            pl.BlockSpec((edge_steps, tm, tn), lambda i, j: (0, i, j)),  # edge_attr (bf16)
        ],
        out_shape=[
            jax.ShapeDtypeStruct((n_pad, n_pad), jnp.float32),
            jax.ShapeDtypeStruct((n_pad, n_pad), jnp.int8),
            jax.ShapeDtypeStruct((edge_steps, n_pad, n_pad), jnp.bfloat16),
        ],
        compiler_params=pltpu.CompilerParams(
            dimension_semantics=("parallel", "parallel"),
            vmem_limit_bytes=32 * 1024 * 1024),
    )(pos_p, pos_t)

    # TODO(synk): n_neighbors top-k truncation, periodic cell offsets, sparse
    # edge-index extraction (dense_to_sparse) and one-hot node features are
    # data-dependent-shape / gather glue and stay outside the kernel.
    cd = cd_p[:n, :n]
    edge_mask = mask_p[:n, :n].astype(bool)
    edge_weight = cd.reshape(n * n, 1)
    edge_attr_t = attr_p[:, :n, :n].reshape(edge_steps, n * n)

    return cd, edge_weight, edge_attr_t, edge_mask


if __name__ == "__main__":
    key = jax.random.PRNGKey(0)
    n_atoms = 16
    edge_steps = 50          # BaseModel default
    self_loop = True         # BaseModel default
    cutoff_r = 3.0

    pos = jax.random.uniform(
        key, (n_atoms, 3), dtype=jnp.float32, minval=0.0, maxval=4.0
    )

    cd, edge_weight, edge_attr_t, edge_mask = generate_graph(
        pos, r=cutoff_r, edge_steps=edge_steps, self_loop=self_loop
    )
    jax.block_until_ready((cd, edge_weight, edge_attr_t, edge_mask))

    # ---- pure-JAX reference -------------------------------------------------
    diff = pos[:, None, :] - pos[None, :, :]
    d_ref = jnp.sqrt(jnp.sum(diff * diff, axis=-1))
    within_ref = (d_ref <= cutoff_r) & (d_ref > 1e-8)
    cd_ref = jnp.where(within_ref, d_ref, 0.0)
    mask_ref = within_ref | jnp.eye(n_atoms, dtype=bool)
    offsets = jnp.linspace(0.0, 1.0, edge_steps, dtype=jnp.float32)
    coeff = -0.5 / (0.2 ** 2)
    w_ref = cd_ref.reshape(-1, 1) / cutoff_r
    attr_ref = jnp.exp(coeff * (w_ref - offsets[None, :]) ** 2)   # (E, K)

    # ---- checks -------------------------------------------------------------
    assert cd.shape == (n_atoms, n_atoms)
    assert edge_weight.shape == (n_atoms * n_atoms, 1)
    assert edge_attr_t.shape == (edge_steps, n_atoms * n_atoms)
    assert bool(jnp.all(jnp.isfinite(cd)))
    assert bool(jnp.all(jnp.isfinite(edge_attr_t.astype(jnp.float32))))
    assert bool(jnp.allclose(cd, cd.T, atol=1e-5))
    assert bool(jnp.allclose(jnp.diag(cd), 0.0))
    assert bool(jnp.allclose(cd, cd_ref, atol=1e-5))
    assert bool(jnp.array_equal(edge_mask, mask_ref))
    assert bool(jnp.allclose(edge_attr_t.astype(jnp.float32).T, attr_ref, atol=2e-2))

    print("KERNEL_OK")
</pallas_src>

<mosaic_0001>
module attributes {stable_mosaic.version = 11 : i64} {
  func.func @_graph_tile_kernel(%arg0: i32, %arg1: i32, %arg2: memref<128x3xf32, #tpu.memory_space<vmem>>, %arg3: memref<3x128xf32, #tpu.memory_space<vmem>>, %arg4: memref<128x128xf32, #tpu.memory_space<vmem>>, %arg5: memref<128x128xi8, #tpu.memory_space<vmem>>, %arg6: memref<50x128x128xbf16, #tpu.memory_space<vmem>>) attributes {dimension_semantics = [#tpu.dimension_semantics<parallel>, #tpu.dimension_semantics<parallel>], iteration_bounds = array<i64: 1, 1>, scalar_prefetch = 0 : i64, scratch_operands = 0 : i64, tpu.core_type = #tpu.core_type<tc>, window_params = [{transform_indices = @transform_0, window_bounds = array<i64: 128, 3>}, {transform_indices = @transform_1, window_bounds = array<i64: 3, 128>}, {transform_indices = @transform_2, window_bounds = array<i64: 128, 128>}, {transform_indices = @transform_3, window_bounds = array<i64: 128, 128>}, {transform_indices = @transform_4, window_bounds = array<i64: 50, 128, 128>}]} {
    %c0 = arith.constant 0 : index
    %c0_0 = arith.constant 0 : index
    %0 = vector.load %arg2[%c0, %c0_0] : memref<128x3xf32, #tpu.memory_space<vmem>>, vector<128x3xf32>
    %c0_1 = arith.constant 0 : index
    %c0_2 = arith.constant 0 : index
    %1 = vector.load %arg3[%c0_1, %c0_2] : memref<3x128xf32, #tpu.memory_space<vmem>>, vector<3x128xf32>
    %2 = vector.extract_strided_slice %0 {offsets = [0, 0], sizes = [128, 1], strides = [1, 1]} : vector<128x3xf32> to vector<128x1xf32>
    %3 = vector.extract_strided_slice %1 {offsets = [0, 0], sizes = [1, 128], strides = [1, 1]} : vector<3x128xf32> to vector<1x128xf32>
    %4 = vector.broadcast %2 : vector<128x1xf32> to vector<128x128xf32>
    %5 = vector.broadcast %3 : vector<1x128xf32> to vector<128x128xf32>
    %6 = arith.subf %4, %5 : vector<128x128xf32>
    %7 = vector.extract_strided_slice %0 {offsets = [0, 1], sizes = [128, 1], strides = [1, 1]} : vector<128x3xf32> to vector<128x1xf32>
    %8 = vector.extract_strided_slice %1 {offsets = [1, 0], sizes = [1, 128], strides = [1, 1]} : vector<3x128xf32> to vector<1x128xf32>
    %9 = vector.broadcast %7 : vector<128x1xf32> to vector<128x128xf32>
    %10 = vector.broadcast %8 : vector<1x128xf32> to vector<128x128xf32>
    %11 = arith.subf %9, %10 : vector<128x128xf32>
    %12 = vector.extract_strided_slice %0 {offsets = [0, 2], sizes = [128, 1], strides = [1, 1]} : vector<128x3xf32> to vector<128x1xf32>
    %13 = vector.extract_strided_slice %1 {offsets = [2, 0], sizes = [1, 128], strides = [1, 1]} : vector<3x128xf32> to vector<1x128xf32>
    %14 = vector.broadcast %12 : vector<128x1xf32> to vector<128x128xf32>
    %15 = vector.broadcast %13 : vector<1x128xf32> to vector<128x128xf32>
    %16 = arith.subf %14, %15 : vector<128x128xf32>
    %17 = arith.mulf %6, %6 : vector<128x128xf32>
    %18 = arith.mulf %11, %11 : vector<128x128xf32>
    %19 = arith.addf %17, %18 : vector<128x128xf32>
    %20 = arith.mulf %16, %16 : vector<128x128xf32>
    %21 = arith.addf %19, %20 : vector<128x128xf32>
    %cst = arith.constant 0.000000e+00 : f32
    %22 = vector.broadcast %cst : f32 to vector<128x128xf32>
    %23 = arith.maximumf %21, %22 : vector<128x128xf32>
    %24 = math.sqrt %23 : vector<128x128xf32>
    %c128_i32 = arith.constant 128 : i32
    %25 = arith.muli %arg0, %c128_i32 : i32
    %26 = tpu.iota {dimensions = array<i32: 0>} : vector<128x128xi32>
    %27 = vector.broadcast %25 : i32 to vector<128x128xi32>
    %28 = arith.addi %27, %26 : vector<128x128xi32>
    %c128_i32_3 = arith.constant 128 : i32
    %29 = arith.muli %arg1, %c128_i32_3 : i32
    %30 = tpu.iota {dimensions = array<i32: 1>} : vector<128x128xi32>
    %31 = vector.broadcast %29 : i32 to vector<128x128xi32>
    %32 = arith.addi %31, %30 : vector<128x128xi32>
    %c16_i32 = arith.constant 16 : i32
    %33 = vector.broadcast %c16_i32 : i32 to vector<128x128xi32>
    %34 = arith.cmpi slt, %28, %33 : vector<128x128xi32>
    %c16_i32_4 = arith.constant 16 : i32
    %35 = vector.broadcast %c16_i32_4 : i32 to vector<128x128xi32>
    %36 = arith.cmpi slt, %32, %35 : vector<128x128xi32>
    %37 = arith.andi %34, %36 : vector<128x128xi1>
    %cst_5 = arith.constant 3.000000e+00 : f32
    %38 = vector.broadcast %cst_5 : f32 to vector<128x128xf32>
    %39 = arith.cmpf ole, %24, %38 : vector<128x128xf32>
    %cst_6 = arith.constant 9.99999993E-9 : f32
    %40 = vector.broadcast %cst_6 : f32 to vector<128x128xf32>
    %41 = arith.cmpf ogt, %24, %40 : vector<128x128xf32>
    %42 = arith.andi %39, %41 : vector<128x128xi1>
    %43 = arith.andi %42, %37 : vector<128x128xi1>
    %cst_7 = arith.constant 0.000000e+00 : f32
    %44 = vector.broadcast %cst_7 : f32 to vector<128x128xf32>
    %45 = arith.select %43, %24, %44 : vector<128x128xi1>, vector<128x128xf32>
    %c0_8 = arith.constant 0 : index
    %c0_9 = arith.constant 0 : index
    %46 = vector.load %arg4[%c0_8, %c0_9] : memref<128x128xf32, #tpu.memory_space<vmem>>, vector<128x128xf32>
    tpu.vector_store %arg4[%c0_8, %c0_9], %45 {strides = array<i32>} : memref<128x128xf32, #tpu.memory_space<vmem>>, vector<128x128xf32>,
    %47 = arith.cmpi eq, %28, %32 : vector<128x128xi32>
    %48 = arith.andi %47, %37 : vector<128x128xi1>
    %49 = arith.ori %43, %48 : vector<128x128xi1>
    %c1_i32 = arith.constant 1 : i32
    %c0_i32 = arith.constant 0 : i32
    %50 = vector.broadcast %c1_i32 : i32 to vector<128x128xi32>
    %51 = vector.broadcast %c0_i32 : i32 to vector<128x128xi32>
    %52 = arith.select %49, %50, %51 : vector<128x128xi1>, vector<128x128xi32>
    %53 = arith.trunci %52 : vector<128x128xi32> to vector<128x128xi8>
    %c0_10 = arith.constant 0 : index
    %c0_11 = arith.constant 0 : index
    %54 = vector.load %arg5[%c0_10, %c0_11] : memref<128x128xi8, #tpu.memory_space<vmem>>, vector<128x128xi8>
    tpu.vector_store %arg5[%c0_10, %c0_11], %53 {strides = array<i32>} : memref<128x128xi8, #tpu.memory_space<vmem>>, vector<128x128xi8>,
    %55 = tpu.iota {dimensions = array<i32: 0>} : vector<50x128x128xi32>
    %56 = arith.sitofp %55 : vector<50x128x128xi32> to vector<50x128x128xf32>
    %cst_12 = arith.constant 0.0204081628 : f32
    %57 = vector.broadcast %cst_12 : f32 to vector<50x128x128xf32>
    %58 = arith.mulf %56, %57 : vector<50x128x128xf32>
    %59 = vector.shape_cast %45 : vector<128x128xf32> to vector<1x128x128xf32>
    %cst_13 = arith.constant 0.333333343 : f32
    %60 = vector.broadcast %cst_13 : f32 to vector<1x128x128xf32>
    %61 = arith.mulf %59, %60 : vector<1x128x128xf32>
    %62 = vector.broadcast %61 : vector<1x128x128xf32> to vector<50x128x128xf32>
    %63 = arith.subf %62, %58 : vector<50x128x128xf32>
    %cst_14 = arith.constant -1.250000e+01 : f32
    %64 = vector.broadcast %cst_14 : f32 to vector<50x128x128xf32>
    %65 = arith.mulf %64, %63 : vector<50x128x128xf32>
    %66 = arith.mulf %65, %63 : vector<50x128x128xf32>
    %67 = math.exp %66 : vector<50x128x128xf32>
    %68 = arith.truncf %67 : vector<50x128x128xf32> to vector<50x128x128xbf16>
    %c0_15 = arith.constant 0 : index
    %c0_16 = arith.constant 0 : index
    %c0_17 = arith.constant 0 : index
    %69 = vector.load %arg6[%c0_15, %c0_16, %c0_17] : memref<50x128x128xbf16, #tpu.memory_space<vmem>>, vector<50x128x128xbf16>
    tpu.vector_store %arg6[%c0_15, %c0_16, %c0_17], %68 {strides = array<i32>} : memref<50x128x128xbf16, #tpu.memory_space<vmem>>, vector<50x128x128xbf16>,
    return
  }
  func.func @transform_0(%arg0: i32, %arg1: i32) -> (i32, i32) {
    %c0_i32 = arith.constant 0 : i32
    %c0_i32_0 = arith.constant 0 : i32
    return %arg0, %c0_i32 : i32, i32
  }
  func.func @transform_1(%arg0: i32, %arg1: i32) -> (i32, i32) {
    %c0_i32 = arith.constant 0 : i32
    %c0_i32_0 = arith.constant 0 : i32
    return %c0_i32, %arg1 : i32, i32
  }
  func.func @transform_2(%arg0: i32, %arg1: i32) -> (i32, i32) {
    %c0_i32 = arith.constant 0 : i32
    return %arg0, %arg1 : i32, i32
  }
  func.func @transform_3(%arg0: i32, %arg1: i32) -> (i32, i32) {
    %c0_i32 = arith.constant 0 : i32
    return %arg0, %arg1 : i32, i32
  }
  func.func @transform_4(%arg0: i32, %arg1: i32) -> (i32, i32, i32) {
    %c0_i32 = arith.constant 0 : i32
    %c0_i32_0 = arith.constant 0 : i32
    return %c0_i32, %arg0, %arg1 : i32, i32, i32
  }
}

</mosaic_0001>

<bundles_post_ra>
// kernel: tpu_custom_call.1
= control target key start
LH: loop header
LB: loop body
LE: loop exit
PB: predicated region body
PF: predicated region fallthrough
CT: control target
= control target key end

     0   :  { %10 = vsyncpa [#allocation3], 0  ;;  %s7474_s0 = inlined_call_operand.vmem [shape: f32[128,3], index: 0, kind: input, shape index: {}]   ;;  %s7475_s1 = inlined_call_operand.hbm [shape: f32[3,128], index: 1, kind: input, shape index: {}]   ;;  %s7476_s2 = inlined_call_operand.hbm [shape: f32[128,128], index: 2, kind: output, shape index: {0}]   ;;  %s7477_s3 = inlined_call_operand.hbm [shape: s8[128,128], index: 3, kind: output, shape index: {1}]   ;;  %s7478_s4 = inlined_call_operand.hbm [shape: bf16[50,128,128], index: 4, kind: output, shape index: {2}]  }
   0x1   :  { %11 = vsyncpa [#allocation4], 0 }
   0x2   :  { %12 = vsyncpa [#allocation7], 0  ;;  %s6194_s15 = smov [#allocation2]   ;;  %s6100_s19 = scalar_lea.hbm %s7475_s1, 64 }
   0x3   :  { %s21_s16 = sshll.u32 %s6194_s15, 4  ;;  %p6101_p0 = scmp.ne.s32.totalorder %s7475_s1, %s6100_s19  ;;  %s22_s16 = int_to_ptr.vmem [resolvable:$true] %s21_s16 }
   0x4   :  { %p6104_p1 = scmp.lt.u32.totalorder %s6100_s19, %s7475_s1 }
   0x6   :  { %p6106_p2 = pnand %p6104_p1, %p6101_p0 }
   0x8   :  { %6109 = shalt.err (!%p6106_p2)
}
   0x9   :  { %s6110_s24 = scalar_lea.vmem %s22_s16, 64  ;;  %p6115_p4 = scmp.lt.s32.totalorder %s22_s16, %s22_s16 }
   0xa   :  { %p6111_p3 = scmp.ne.s32.totalorder %s22_s16, %s6110_s24  ;;  %p6116_p5 = scmp.lt.s32.totalorder %s6110_s24, %s6110_s24 }
   0xc   :  { %p6117_p6 = por %p6116_p5, %p6115_p4 }
   0xe   :  { %p6118_p7 = pnand %p6117_p6, %p6111_p3 }
  0x10   :  { %6121 = shalt.err (!%p6118_p7)
}
  0x11   :  { %24 = dma.hbm_to_vmem [thread:$0]  %s7475_s1, 64, %s22_s16, [#allocation3]  }
  0x12   :  { %6188 = dma.done.wait [#allocation3], 64  }
  0x13   :  { %6189 = vsyncadd [#allocation3], 4294967232  ;;  %v6195_v0 = vmov 1   ;;  %v6196_v1 = vmov 0   ;;  %v28_v3 = vld [vmem:[%s7474_s0] sm:$0xff]  ;;  %v29_v4 = vld [vmem:[%s7474_s0 + $0x8] sm:$0xff]  ;;  %v125_v7 = vlaneseq }
  0x14   :  { %5893 = vset.pattern.permute.xlu1 %v6195_v0  ;;  %5892 = vset.pattern.permute.xlu0 %v6196_v1  ;;  %v759_v2 = vpack.c.b8 %v6196_v1, %v6196_v1  ;;  %v6197_v5 = vmov 2   ;;  %v6198_v6 = vmov 0.0   ;;  %v44_v11 = vld [vmem:[#allocation2] sm:$0x7]  ;;  %s6199_s0 = smov [#allocation5]   ;;  %s6200_s5 = smov [#allocation6]  }
  0x15   :  { %146 = vperm.xlu1 %5893, %v28_v3   ;;  %47 = vperm.xlu0 %5892, %v28_v3   ;;  %676 = vst [vmem:[#allocation5 + $0x10] sm:$0xff] %v6198_v6  ;;  %677 = vst [vmem:[#allocation5 + $0x18] sm:$0xff] %v6198_v6  ;;  %v126_v8 = vshrl.u32 %v125_v7, 7  ;;  %v558_v40 = vand.u32 127, %v125_v7  ;;  %s5691_s30 = sshll.u32 %s6199_s0, 4  ;;  %s5703_s6 = sshll.u32 %s6200_s5, 4  ;;  %s5692_s30 = int_to_ptr.vmem [resolvable:$true] %s5691_s30  ;;  %s5704_s6 = int_to_ptr.vmem [resolvable:$true] %s5703_s6 }
  0x16   :  { %767 = vst [vmem:[#allocation6 + $0x8] sm:$0xff] %v759_v2  ;;  %768 = vst [vmem:[#allocation6 + $0x10] sm:$0xff] %v759_v2  ;;  %s6122_s7 = scalar_lea.vmem %s5692_s30, 2048  ;;  %p6127_p9 = scmp.lt.s32.totalorder %s5692_s30, %s5692_s30 }
  0x17   :  { %769 = vst [vmem:[#allocation6 + $0x18] sm:$0xff] %v759_v2  ;;  %678 = vst [vmem:[#allocation5 + $0x20] sm:$0xff] %v6198_v6  ;;  %v211_v9 = vsub.s32 1, %v126_v8  ;;  %v127_v10 = vsub.s32 0, %v126_v8  ;;  %v295_v16 = vsub.s32 2, %v126_v8  ;;  %v524_v41 = vadd.s32 8, %v126_v8  ;;  %p6123_p8 = scmp.ne.s32.totalorder %s5692_s30, %s6122_s7  ;;  %p6128_p10 = scmp.lt.s32.totalorder %s6122_s7, %s6122_s7 }
  0x18   :  { %679 = vst [vmem:[#allocation5 + $0x28] sm:$0xff] %v6198_v6  ;;  %680 = vst [vmem:[#allocation5 + $0x30] sm:$0xff] %v6198_v6  ;;  %vm577_vm0 = vcmp.lt.s32.totalorder %v558_v40, 16  ;;  %vm690_vm1 = vcmp.eq.s32.totalorder %v126_v8, %v558_v40 }
  0x19   :  { %150 = vperm.xlu1 %5893, %v29_v4   ;;  %52 = vperm.xlu0 %5892, %v29_v4   ;;  %681 = vst [vmem:[#allocation5 + $0x38] sm:$0xff] %v6198_v6  ;;  %682 = vst [vmem:[#allocation5 + $0x40] sm:$0xff] %v6198_v6  ;;  %v212_v12 = vrot.slane %v44_v11, %v211_v9  ;;  %v128_v14 = vrot.slane %v44_v11, %v127_v10  ;;  %p6129_p11 = por %p6128_p10, %p6127_p9 }
  0x1a   :  { %683 = vst [vmem:[#allocation5 + $0x48] sm:$0xff] %v6198_v6  ;;  %684 = vst [vmem:[#allocation5 + $0x50] sm:$0xff] %v6198_v6  ;;  %v296_v23 = vrot.slane %v44_v11, %v295_v16  ;;  %vm691_vm3 = vcmp.eq.s32.totalorder %v524_v41, %v558_v40 }
  0x1b   :  { %685 = vst [vmem:[#allocation5 + $0x58] sm:$0xff] %v6198_v6  ;;  %686 = vst [vmem:[#allocation5 + $0x60] sm:$0xff] %v6198_v6  ;;  %p6130_p12 = pnand %p6129_p11, %p6123_p8 }
  0x1c   :  { %687 = vst [vmem:[#allocation5 + $0x68] sm:$0xff] %v6198_v6  ;;  %688 = vst [vmem:[#allocation5 + $0x70] sm:$0xff] %v6198_v6 }
  0x1d   :  { %5895 = vset.pattern.permute.xlu1 %v6197_v5  ;;  %5894 = vset.pattern.permute.xlu0 %v6197_v5  ;;  %689 = vst [vmem:[#allocation5 + $0x78] sm:$0xff] %v6198_v6  ;;  %vm6301_vm7 = vmand %vm690_vm1, %vm577_vm0 }
  0x1e   :  { %234 = vperm.xlu1 %5895, %v29_v4   ;;  %230 = vperm.xlu0 %5894, %v28_v3   ;;  %vm6306_vm10 = vmand %vm691_vm3, %vm577_vm0 }
  0x94   :  { %v147_v13 = vpop.permute.xlu1 %146  ;;  %v48_v15 = vpop.permute.xlu0 %47 }
  0x95   :  { %v213_v17 = vsub.f32 %v147_v13, %v212_v12  ;;  %v129_v18 = vsub.f32 %v48_v15, %v128_v14 }
  0x97   :  { %v329_v24 = vmul.f32 %v213_v17, %v213_v17  ;;  %v313_v25 = vmul.f32 %v129_v18, %v129_v18 }
  0x98   :  { %v151_v19 = vpop.permute.xlu1 %150  ;;  %v53_v20 = vpop.permute.xlu0 %52 }
  0x99   :  { %v214_v21 = vsub.f32 %v151_v19, %v212_v12  ;;  %v130_v22 = vsub.f32 %v53_v20, %v128_v14  ;;  %v345_v32 = vadd.f32 %v329_v24, %v313_v25 }
  0x9b   :  { %v330_v26 = vmul.f32 %v214_v21, %v214_v21  ;;  %v314_v27 = vmul.f32 %v130_v22, %v130_v22 }
  0x9d   :  { %v235_v28 = vpop.permute.xlu1 %234  ;;  %v231_v29 = vpop.permute.xlu0 %230  ;;  %v346_v33 = vadd.f32 %v330_v26, %v314_v27 }
  0x9e   :  { %v298_v30 = vsub.f32 %v235_v28, %v296_v23  ;;  %v297_v31 = vsub.f32 %v231_v29, %v296_v23 }
  0xa0   :  { %v362_v34 = vmul.f32 %v298_v30, %v298_v30  ;;  %v361_v35 = vmul.f32 %v297_v31, %v297_v31 }
  0xa2   :  { %v378_v36 = vadd.f32 %v362_v34, %v346_v33  ;;  %v377_v37 = vadd.f32 %v361_v35, %v345_v32 }
  0xa4   :  { %v394_v38 = vmax.f32 %v378_v36, 0.0  ;;  %v393_v39 = vmax.f32 %v377_v37, 0.0 }
  0xa6   :  { %5896 = vrsqrt.f32 %v394_v38  ;;  %vm418_vm2 = vcmp.eq.f32.partialorder %v394_v38, inf  ;;  %v421_v45 = vand.u32 2147483648, %v394_v38  ;;  %vm420_vm4 = vcmp.eq.f32.partialorder %v394_v38, 0.0 }
  0xa7   :  { %5898 = vrsqrt.f32 %v393_v39  ;;  %vm411_vm5 = vcmp.eq.f32.partialorder %v393_v39, inf  ;;  %v414_v48 = vand.u32 2147483648, %v393_v39  ;;  %vm413_vm6 = vcmp.eq.f32.partialorder %v393_v39, 0.0 }
  0xb0   :  { %v5897_v42 = vpop.eup %5896 }
  0xb1   :  { %v5899_v43 = vpop.eup %5898  ;;  %v417_v44 = vmul.f32 %v5897_v42, %v394_v38 }
  0xb2   :  { %v410_v46 = vmul.f32 %v5899_v43, %v393_v39 }
  0xb3   :  { %v419_v47 = vsel %vm418_vm2, %v394_v38, %v417_v44 }
  0xb4   :  { %v422_v49 = vsel %vm420_vm4, %v421_v45, %v419_v47  ;;  %v412_v50 = vsel %vm411_vm5, %v393_v39, %v410_v46 }
  0xb5   :  { %v415_v52 = vsel %vm413_vm6, %v414_v48, %v412_v50  ;;  %vm595_vm8 = vcmp.le.f32.partialorder %v422_v49, 3.0  ;;  %vm611_vm9 = vcmp.gt.f32.partialorder %v422_v49, 1e-08 }
  0xb6   :  { %vm594_vm11 = vcmp.le.f32.partialorder %v415_v52, 3.0  ;;  %vm610_vm12 = vcmp.gt.f32.partialorder %v415_v52, 1e-08  ;;  %vm627_vm13 = vmand %vm595_vm8, %vm611_vm9 }
  0xb7   :  { %vm626_vm14 = vmand %vm594_vm11, %vm610_vm12 }
  0xb8   :  { %vm642_vm15 = vmand %vm626_vm14, %vm577_vm0 }
  0xb9   :  { %vm643_vm1 = vmand %vm627_vm13, %vm577_vm0  ;;  %v658_v54 = vsel %vm642_vm15, %v415_v52, 0.0 }
  0xba   :  { %v659_v55 = vsel %vm643_vm1, %v422_v49, 0.0  ;;  %674 = vst [vmem:[#allocation5] sm:$0xff] %v658_v54  ;;  %vm722_vm2 = vmor %vm642_vm15, %vm6301_vm7 }
  0xbb   :  { %675 = vst [vmem:[#allocation5 + $0x8] sm:$0xff] %v659_v55  ;;  %vm723_vm3 = vmor %vm643_vm1, %vm6306_vm10  ;;  %v738_v56 = vsel %vm722_vm2, 1, %v6196_v1 }
  0xbc   :  { %v739_v57 = vsel %vm723_vm3, 1, %v6196_v1 }
  0xbd   :  { %6133 = shalt.err (!%p6130_p12)
}
  0xbe   :  { %s6134_s10 = scalar_lea.hbm %s7476_s2, 2048 }
  0xbf   :  { %p6135_p13 = scmp.ne.s32.totalorder %s7476_s2, %s6134_s10  ;;  %p6138_p0 = scmp.lt.u32.totalorder %s6134_s10, %s7476_s2 }
  0xc1   :  { %p6140_p1 = pnand %p6138_p0, %p6135_p13 }
  0xc3   :  { %6143 = shalt.err (!%p6140_p1)
}
  0xc4   :  { %s6201_s15 = smov 128   ;;  %s6202_s16 = smov 8   ;;  %v754_v58 = vpack.c.b16 %v739_v57, %v738_v56 }
  0xc5   :  { %5697 = dma.vmem_to_hbm [thread:$0]  %s5692_s30, 2048, %s7476_s2, [#allocation4], %s6201_s15, %s6201_s15, %s6202_s16  }
  0xc6   :  { %v756_v59 = vpack.c.b8 %v6196_v1, %v754_v58  ;;  %s6144_s19 = scalar_lea.vmem %s5704_s6, 512  ;;  %p6149_p3 = scmp.lt.s32.totalorder %s5704_s6, %s5704_s6 }
  0xc7   :  { %p6145_p2 = scmp.ne.s32.totalorder %s5704_s6, %s6144_s19  ;;  %p6150_p4 = scmp.lt.s32.totalorder %s6144_s19, %s6144_s19 }
  0xc8   :  { %766 = vst [vmem:[#allocation6] sm:$0xff] %v756_v59 }
  0xc9   :  { %p6151_p5 = por %p6150_p4, %p6149_p3 }
  0xcb   :  { %p6152_p6 = pnand %p6151_p5, %p6145_p2 }
  0xcd   :  { %6155 = shalt.err (!%p6152_p6)
}
  0xce   :  { %s6156_s22 = scalar_lea.hbm %s7477_s3, 512 }
  0xcf   :  { %p6157_p7 = scmp.ne.s32.totalorder %s7477_s3, %s6156_s22  ;;  %p6160_p8 = scmp.lt.u32.totalorder %s6156_s22, %s7477_s3 }
  0xd1   :  { %p6162_p9 = pnand %p6160_p8, %p6157_p7 }
  0xd3   :  { %6165 = shalt.err (!%p6162_p9)
}
  0xd4   :  { %5709 = dma.vmem_to_hbm [thread:$0]  %s5704_s6, 512, %s7477_s3, [#allocation7], %s6201_s15, %s6201_s15, %s6202_s16   ;;  %v6349_v60 = vmul.f32 0.33333334, %v658_v54  ;;  %v6351_v61 = vmul.f32 0.33333334, %v659_v55 }
  0xd5   :  { %s6253_s3 = smov [#allocation8]  }
  0xd6   :  { %v6354_v62 = vadd.f32 -0.020408163, %v6349_v60  ;;  %v6357_v63 = vadd.f32 -0.020408163, %v6351_v61  ;;  %v6360_v0 = vadd.f32 -0.040816326, %v6349_v60 }
  0xd7   :  { %v6363_v1 = vadd.f32 -0.040816326, %v6351_v61  ;;  %v6366_v2 = vadd.f32 -0.06122449, %v6349_v60  ;;  %v6369_v3 = vadd.f32 -0.06122449, %v6351_v61 }
  0xd8   :  { %7581 = vst [vmem:[#allocation12_spill] sm:$0xff] %v6354_v62  ;;  %7582 = vst [vmem:[#allocation13_spill] sm:$0xff] %v6357_v63  ;;  %v6372_v4 = vadd.f32 -0.08163265, %v6349_v60  ;;  %v6375_v5 = vadd.f32 -0.08163265, %v6351_v61 }
  0xd9   :  { %7583 = vst [vmem:[#allocation14_spill] sm:$0xff] %v6360_v0  ;;  %7584 = vst [vmem:[#allocation15_spill] sm:$0xff] %v6363_v1  ;;  %v6378_v6 = vadd.f32 -0.10204081, %v6349_v60  ;;  %v6381_v7 = vadd.f32 -0.10204081, %v6351_v61 }
  0xda   :  { %7585 = vst [vmem:[#allocation16_spill] sm:$0xff] %v6366_v2  ;;  %7586 = vst [vmem:[#allocation17_spill] sm:$0xff] %v6369_v3  ;;  %v6384_v8 = vadd.f32 -0.12244898, %v6349_v60  ;;  %v6387_v9 = vadd.f32 -0.12244898, %v6351_v61 }
  0xdb   :  { %7587 = vst [vmem:[#allocation18_spill] sm:$0xff] %v6372_v4  ;;  %7588 = vst [vmem:[#allocation19_spill] sm:$0xff] %v6375_v5  ;;  %v6390_v10 = vadd.f32 -0.14285713, %v6349_v60  ;;  %v6393_v11 = vadd.f32 -0.14285713, %v6351_v61 }
  0xdc   :  { %7589 = vst [vmem:[#allocation20_spill] sm:$0xff] %v6378_v6  ;;  %7590 = vst [vmem:[#allocation21_spill] sm:$0xff] %v6381_v7  ;;  %v6396_v12 = vadd.f32 -0.1632653, %v6349_v60  ;;  %v6399_v13 = vadd.f32 -0.1632653, %v6351_v61 }
  0xdd   :  { %7591 = vst [vmem:[#allocation22_spill] sm:$0xff] %v6384_v8  ;;  %7592 = vst [vmem:[#allocation23_spill] sm:$0xff] %v6387_v9  ;;  %v6402_v14 = vadd.f32 -0.18367347, %v6349_v60  ;;  %v6405_v15 = vadd.f32 -0.18367347, %v6351_v61 }
  0xde   :  { %7593 = vst [vmem:[#allocation24_spill] sm:$0xff] %v6390_v10  ;;  %7594 = vst [vmem:[#allocation25_spill] sm:$0xff] %v6393_v11  ;;  %v6408_v16 = vadd.f32 -0.20408162, %v6349_v60  ;;  %v6411_v17 = vadd.f32 -0.20408162, %v6351_v61 }
  0xdf   :  { %7595 = vst [vmem:[#allocation26_spill] sm:$0xff] %v6396_v12  ;;  %7596 = vst [vmem:[#allocation27_spill] sm:$0xff] %v6399_v13  ;;  %v6414_v18 = vadd.f32 -0.2244898, %v6349_v60  ;;  %v6417_v19 = vadd.f32 -0.2244898, %v6351_v61 }
  0xe0   :  { %7597 = vst [vmem:[#allocation28_spill] sm:$0xff] %v6402_v14  ;;  %7598 = vst [vmem:[#allocation29_spill] sm:$0xff] %v6405_v15  ;;  %v6420_v20 = vadd.f32 -0.24489796, %v6349_v60  ;;  %v6423_v21 = vadd.f32 -0.24489796, %v6351_v61 }
  0xe1   :  { %7599 = vst [vmem:[#allocation30_spill] sm:$0xff] %v6408_v16  ;;  %7600 = vst [vmem:[#allocation31_spill] sm:$0xff] %v6411_v17  ;;  %v6426_v22 = vadd.f32 -0.26530612, %v6349_v60  ;;  %v6429_v23 = vadd.f32 -0.26530612, %v6351_v61 }
  0xe2   :  { %7601 = vst [vmem:[#allocation32_spill] sm:$0xff] %v6414_v18  ;;  %7602 = vst [vmem:[#allocation33_spill] sm:$0xff] %v6417_v19  ;;  %v6432_v24 = vadd.f32 -0.28571427, %v6349_v60  ;;  %v6435_v25 = vadd.f32 -0.28571427, %v6351_v61 }
  0xe3   :  { %7603 = vst [vmem:[#allocation34_spill] sm:$0xff] %v6420_v20  ;;  %7604 = vst [vmem:[#allocation35_spill] sm:$0xff] %v6423_v21  ;;  %v6438_v26 = vadd.f32 -0.30612245, %v6349_v60  ;;  %v6441_v27 = vadd.f32 -0.30612245, %v6351_v61 }
  0xe4   :  { %7605 = vst [vmem:[#allocation36_spill] sm:$0xff] %v6426_v22  ;;  %7606 = vst [vmem:[#allocation37_spill] sm:$0xff] %v6429_v23  ;;  %v6444_v28 = vadd.f32 -0.3265306, %v6349_v60  ;;  %v6447_v29 = vadd.f32 -0.3265306, %v6351_v61 }
  0xe5   :  { %7607 = vst [vmem:[#allocation38_spill] sm:$0xff] %v6432_v24  ;;  %7608 = vst [vmem:[#allocation39_spill] sm:$0xff] %v6435_v25  ;;  %v6450_v30 = vadd.f32 -0.34693876, %v6349_v60  ;;  %v6453_v31 = vadd.f32 -0.34693876, %v6351_v61 }
  0xe6   :  { %7609 = vst [vmem:[#allocation40_spill] sm:$0xff] %v6438_v26  ;;  %7610 = vst [vmem:[#allocation41_spill] sm:$0xff] %v6441_v27  ;;  %v6456_v32 = vadd.f32 -0.36734694, %v6349_v60  ;;  %v6459_v33 = vadd.f32 -0.36734694, %v6351_v61 }
  0xe7   :  { %7611 = vst [vmem:[#allocation42_spill] sm:$0xff] %v6444_v28  ;;  %7612 = vst [vmem:[#allocation43_spill] sm:$0xff] %v6447_v29  ;;  %v6462_v34 = vadd.f32 -0.3877551, %v6349_v60  ;;  %v6465_v35 = vadd.f32 -0.3877551, %v6351_v61 }
  0xe8   :  { %7613 = vst [vmem:[#allocation44_spill] sm:$0xff] %v6450_v30  ;;  %7614 = vst [vmem:[#allocation45_spill] sm:$0xff] %v6453_v31  ;;  %v6468_v36 = vadd.f32 -0.40816325, %v6349_v60  ;;  %v6471_v37 = vadd.f32 -0.40816325, %v6351_v61 }
  0xe9   :  { %7615 = vst [vmem:[#allocation46_spill] sm:$0xff] %v6456_v32  ;;  %7616 = vst [vmem:[#allocation47_spill] sm:$0xff] %v6459_v33  ;;  %v6474_v38 = vadd.f32 -0.42857143, %v6349_v60  ;;  %v6477_v39 = vadd.f32 -0.42857143, %v6351_v61 }
  0xea   :  { %7617 = vst [vmem:[#allocation48_spill] sm:$0xff] %v6462_v34  ;;  %7618 = vst [vmem:[#allocation49_spill] sm:$0xff] %v6465_v35  ;;  %v6480_v40 = vadd.f32 -0.4489796, %v6349_v60  ;;  %v6483_v41 = vadd.f32 -0.4489796, %v6351_v61 }
  0xeb   :  { %7619 = vst [vmem:[#allocation50_spill] sm:$0xff] %v6468_v36  ;;  %7620 = vst [vmem:[#allocation51_spill] sm:$0xff] %v6471_v37  ;;  %v6486_v42 = vadd.f32 -0.46938774, %v6349_v60  ;;  %v6489_v43 = vadd.f32 -0.46938774, %v6351_v61 }
  0xec   :  { %7621 = vst [vmem:[#allocation52_spill] sm:$0xff] %v6474_v38  ;;  %7622 = vst [vmem:[#allocation53_spill] sm:$0xff] %v6477_v39  ;;  %v6492_v44 = vadd.f32 -0.48979592, %v6349_v60  ;;  %v6495_v45 = vadd.f32 -0.48979592, %v6351_v61 }
  0xed   :  { %7623 = vst [vmem:[#allocation54_spill] sm:$0xff] %v6480_v40  ;;  %7624 = vst [vmem:[#allocation55_spill] sm:$0xff] %v6483_v41  ;;  %v6498_v46 = vadd.f32 -0.5102041, %v6349_v60  ;;  %v6501_v47 = vadd.f32 -0.5102041, %v6351_v61 }
  0xee   :  { %7625 = vst [vmem:[#allocation56_spill] sm:$0xff] %v6486_v42  ;;  %7626 = vst [vmem:[#allocation57_spill] sm:$0xff] %v6489_v43  ;;  %v6504_v48 = vadd.f32 -0.53061223, %v6349_v60  ;;  %v6507_v49 = vadd.f32 -0.53061223, %v6351_v61 }
  0xef   :  { %7627 = vst [vmem:[#allocation58_spill] sm:$0xff] %v6492_v44  ;;  %7628 = vst [vmem:[#allocation59_spill] sm:$0xff] %v6495_v45  ;;  %v6510_v50 = vadd.f32 -0.5510204, %v6349_v60  ;;  %v6513_v51 = vadd.f32 -0.5510204, %v6351_v61 }
  0xf0   :  { %7629 = vst [vmem:[#allocation60_spill] sm:$0xff] %v6498_v46  ;;  %7630 = vst [vmem:[#allocation61_spill] sm:$0xff] %v6501_v47  ;;  %v6516_v52 = vadd.f32 -0.57142854, %v6349_v60  ;;  %v6519_v53 = vadd.f32 -0.57142854, %v6351_v61 }
  0xf1   :  { %7631 = vst [vmem:[#allocation62_spill] sm:$0xff] %v6504_v48  ;;  %7632 = vst [vmem:[#allocation63_spill] sm:$0xff] %v6507_v49  ;;  %v6522_v54 = vadd.f32 -0.59183675, %v6349_v60  ;;  %v6525_v55 = vadd.f32 -0.59183675, %v6351_v61 }
  0xf2   :  { %7633 = vst [vmem:[#allocation64_spill] sm:$0xff] %v6510_v50  ;;  %7634 = vst [vmem:[#allocation65_spill] sm:$0xff] %v6513_v51  ;;  %v6528_v56 = vadd.f32 -0.6122449, %v6349_v60  ;;  %v6531_v57 = vadd.f32 -0.6122449, %v6351_v61 }
  0xf3   :  { %7635 = vst [vmem:[#allocation66_spill] sm:$0xff] %v6516_v52  ;;  %7636 = vst [vmem:[#allocation67_spill] sm:$0xff] %v6519_v53  ;;  %v6534_v58 = vadd.f32 -0.63265306, %v6349_v60  ;;  %v6537_v59 = vadd.f32 -0.63265306, %v6351_v61 }
  0xf4   :  { %7637 = vst [vmem:[#allocation68_spill] sm:$0xff] %v6522_v54  ;;  %7638 = vst [vmem:[#allocation69_spill] sm:$0xff] %v6525_v55  ;;  %v6540_v53 = vadd.f32 -0.6530612, %v6349_v60  ;;  %v6543_v54 = vadd.f32 -0.6530612, %v6351_v61 }
  0xf5   :  { %7639 = vst [vmem:[#allocation70_spill] sm:$0xff] %v6528_v56  ;;  %7640 = vst [vmem:[#allocation71_spill] sm:$0xff] %v6531_v57  ;;  %v6546_v55 = vadd.f32 -0.67346936, %v6349_v60  ;;  %v6549_v56 = vadd.f32 -0.67346936, %v6351_v61 }
  0xf6   :  { %7641 = vst [vmem:[#allocation72_spill] sm:$0xff] %v6534_v58  ;;  %7642 = vst [vmem:[#allocation73_spill] sm:$0xff] %v6537_v59  ;;  %v6552_v57 = vadd.f32 -0.6938775, %v6349_v60  ;;  %v6555_v58 = vadd.f32 -0.6938775, %v6351_v61 }
  0xf7   :  { %7643 = vst [vmem:[#allocation74_spill] sm:$0xff] %v6540_v53  ;;  %7644 = vst [vmem:[#allocation75_spill] sm:$0xff] %v6543_v54  ;;  %v6558_v59 = vadd.f32 -0.7142857, %v6349_v60  ;;  %v6561_v53 = vadd.f32 -0.7142857, %v6351_v61 }
  0xf8   :  { %7645 = vst [vmem:[#allocation76_spill] sm:$0xff] %v6546_v55  ;;  %7646 = vst [vmem:[#allocation77_spill] sm:$0xff] %v6549_v56  ;;  %v6564_v54 = vadd.f32 -0.7346939, %v6349_v60  ;;  %v6567_v55 = vadd.f32 -0.7346939, %v6351_v61 }
  0xf9   :  { %7647 = vst [vmem:[#allocation78_spill] sm:$0xff] %v6552_v57  ;;  %7648 = vst [vmem:[#allocation79_spill] sm:$0xff] %v6555_v58  ;;  %v6570_v56 = vadd.f32 -0.75510204, %v6349_v60  ;;  %v6573_v57 = vadd.f32 -0.75510204, %v6351_v61 }
  0xfa   :  { %7649 = vst [vmem:[#allocation80_spill] sm:$0xff] %v6558_v59  ;;  %7650 = vst [vmem:[#allocation81_spill] sm:$0xff] %v6561_v53  ;;  %v6576_v58 = vadd.f32 -0.7755102, %v6349_v60  ;;  %v6579_v59 = vadd.f32 -0.7755102, %v6351_v61 }
  0xfb   :  { %7651 = vst [vmem:[#allocation82_spill] sm:$0xff] %v6564_v54  ;;  %7652 = vst [vmem:[#allocation83_spill] sm:$0xff] %v6567_v55  ;;  %v6582_v53 = vadd.f32 -0.79591835, %v6349_v60  ;;  %v6585_v54 = vadd.f32 -0.79591835, %v6351_v61 }
  0xfc   :  { %7653 = vst [vmem:[#allocation84_spill] sm:$0xff] %v6570_v56  ;;  %7654 = vst [vmem:[#allocation85_spill] sm:$0xff] %v6573_v57  ;;  %v6588_v55 = vadd.f32 -0.8163265, %v6349_v60  ;;  %v6591_v56 = vadd.f32 -0.8163265, %v6351_v61 }
  0xfd   :  { %7655 = vst [vmem:[#allocation86_spill] sm:$0xff] %v6576_v58  ;;  %7656 = vst [vmem:[#allocation87_spill] sm:$0xff] %v6579_v59  ;;  %v6594_v57 = vadd.f32 -0.83673465, %v6349_v60  ;;  %v6597_v58 = vadd.f32 -0.83673465, %v6351_v61 }
  0xfe   :  { %7657 = vst [vmem:[#allocation88_spill] sm:$0xff] %v6582_v53  ;;  %7658 = vst [vmem:[#allocation89_spill] sm:$0xff] %v6585_v54  ;;  %v6600_v59 = vadd.f32 -0.85714287, %v6349_v60  ;;  %v6603_v53 = vadd.f32 -0.85714287, %v6351_v61 }
  0xff   :  { %7659 = vst [vmem:[#allocation90_spill] sm:$0xff] %v6588_v55  ;;  %7660 = vst [vmem:[#allocation91_spill] sm:$0xff] %v6591_v56  ;;  %v6606_v54 = vadd.f32 -0.877551, %v6349_v60  ;;  %v6609_v55 = vadd.f32 -0.877551, %v6351_v61 }
 0x100   :  { %7661 = vst [vmem:[#allocation92_spill] sm:$0xff] %v6594_v57  ;;  %7662 = vst [vmem:[#allocation93_spill] sm:$0xff] %v6597_v58  ;;  %v6612_v56 = vadd.f32 -0.8979592, %v6349_v60  ;;  %v6615_v57 = vadd.f32 -0.8979592, %v6351_v61 }
 0x101   :  { %7663 = vst [vmem:[#allocation94_spill] sm:$0xff] %v6600_v59  ;;  %7664 = vst [vmem:[#allocation95_spill] sm:$0xff] %v6603_v53  ;;  %v6618_v58 = vadd.f32 -0.9183673, %v6349_v60  ;;  %v6621_v59 = vadd.f32 -0.9183673, %v6351_v61 }
 0x102   :  { %7665 = vst [vmem:[#allocation96_spill] sm:$0xff] %v6606_v54  ;;  %7666 = vst [vmem:[#allocation97_spill] sm:$0xff] %v6609_v55  ;;  %v6624_v53 = vadd.f32 -0.9387755, %v6349_v60  ;;  %v6627_v54 = vadd.f32 -0.9387755, %v6351_v61 }
 0x103   :  { %7667 = vst [vmem:[#allocation98_spill] sm:$0xff] %v6612_v56  ;;  %7668 = vst [vmem:[#allocation99_spill] sm:$0xff] %v6615_v57  ;;  %v6630_v55 = vadd.f32 -0.95918363, %v6349_v60  ;;  %v6633_v56 = vadd.f32 -0.95918363, %v6351_v61 }
 0x104   :  { %7669 = vst [vmem:[#allocation100_spill] sm:$0xff] %v6618_v58  ;;  %7670 = vst [vmem:[#allocation101_spill] sm:$0xff] %v6621_v59  ;;  %v6636_v57 = vadd.f32 -0.97959185, %v6349_v60  ;;  %v6639_v58 = vadd.f32 -0.97959185, %v6351_v61 }
 0x105   :  { %7671 = vst [vmem:[#allocation102_spill] sm:$0xff] %v6624_v53  ;;  %7672 = vst [vmem:[#allocation103_spill] sm:$0xff] %v6627_v54  ;;  %v6642_v59 = vadd.f32 -1.0, %v6349_v60  ;;  %v6645_v53 = vadd.f32 -1.0, %v6351_v61  ;;  %v6648_v54 = vmul.f32 -12.5, %v6349_v60  ;;  %s5715_s28 = sshll.u32 %s6253_s3, 4  ;;  %s5716_s28 = int_to_ptr.vmem [resolvable:$true] %s5715_s28 }
 0x106   :  { %7673 = vst [vmem:[#allocation104_spill] sm:$0xff] %v6630_v55  ;;  %7674 = vst [vmem:[#allocation105_spill] sm:$0xff] %v6633_v56  ;;  %v6651_v55 = vmul.f32 -12.5, %v6351_v61  ;;  %v6654_v56 = vmul.f32 -12.5, %v6354_v62  ;;  %v6675_v62 = vmul.f32 -12.5, %v6375_v5  ;;  %v6696_v5 = vmul.f32 -12.5, %v6396_v12  ;;  %p6171_p11 = scmp.lt.s32.totalorder %s5716_s28, %s5716_s28 }
 0x107   :  { %7675 = vst [vmem:[#allocation106_spill] sm:$0xff] %v6636_v57  ;;  %7676 = vst [vmem:[#allocation107_spill] sm:$0xff] %v6639_v58  ;;  %v6657_v57 = vmul.f32 -12.5, %v6357_v63  ;;  %v6660_v58 = vmul.f32 -12.5, %v6360_v0  ;;  %v6678_v63 = vmul.f32 -12.5, %v6378_v6  ;;  %v6681_v0 = vmul.f32 -12.5, %v6381_v7 }
 0x108   :  { %7677 = vst [vmem:[#allocation108_spill] sm:$0xff] %v6642_v59  ;;  %7678 = vst [vmem:[#allocation109_spill] sm:$0xff] %v6645_v53  ;;  %v6663_v59 = vmul.f32 -12.5, %v6363_v1  ;;  %v6666_v53 = vmul.f32 -12.5, %v6366_v2  ;;  %v6684_v1 = vmul.f32 -12.5, %v6384_v8  ;;  %v6687_v2 = vmul.f32 -12.5, %v6387_v9 }
 0x109   :  { %7679 = vst [vmem:[#allocation110_spill] sm:$0xff] %v6648_v54  ;;  %7680 = vst [vmem:[#allocation111_spill] sm:$0xff] %v6651_v55  ;;  %v6669_v54 = vmul.f32 -12.5, %v6369_v3  ;;  %v6672_v55 = vmul.f32 -12.5, %v6372_v4  ;;  %v6690_v3 = vmul.f32 -12.5, %v6390_v10  ;;  %v6693_v4 = vmul.f32 -12.5, %v6393_v11 }
 0x10a   :  { %v6699_v6 = vmul.f32 -12.5, %v6399_v13  ;;  %v6702_v7 = vmul.f32 -12.5, %v6402_v14  ;;  %v6705_v8 = vmul.f32 -12.5, %v6405_v15  ;;  %v6708_v9 = vmul.f32 -12.5, %v6408_v16  ;;  %s6166_s1 = scalar_lea.vmem %s5716_s28, 51200 }
 0x10b   :  { %v6711_v10 = vmul.f32 -12.5, %v6411_v17  ;;  %v6714_v11 = vmul.f32 -12.5, %v6414_v18  ;;  %v6717_v12 = vmul.f32 -12.5, %v6417_v19  ;;  %v6720_v13 = vmul.f32 -12.5, %v6420_v20  ;;  %p6167_p10 = scmp.ne.s32.totalorder %s5716_s28, %s6166_s1  ;;  %p6172_p12 = scmp.lt.s32.totalorder %s6166_s1, %s6166_s1 }
 0x10c   :  { %v6723_v14 = vmul.f32 -12.5, %v6423_v21  ;;  %v6726_v15 = vmul.f32 -12.5, %v6426_v22  ;;  %v6729_v16 = vmul.f32 -12.5, %v6429_v23  ;;  %v6732_v17 = vmul.f32 -12.5, %v6432_v24 }
 0x10d   :  { %v6735_v18 = vmul.f32 -12.5, %v6435_v25  ;;  %v6738_v19 = vmul.f32 -12.5, %v6438_v26  ;;  %v6741_v20 = vmul.f32 -12.5, %v6441_v27  ;;  %v6744_v21 = vmul.f32 -12.5, %v6444_v28  ;;  %p6173_p13 = por %p6172_p12, %p6171_p11 }
 0x10e   :  { %v6747_v22 = vmul.f32 -12.5, %v6447_v29  ;;  %v6750_v23 = vmul.f32 -12.5, %v6450_v30  ;;  %v6753_v24 = vmul.f32 -12.5, %v6453_v31  ;;  %v6756_v25 = vmul.f32 -12.5, %v6456_v32 }
 0x10f   :  { %v6759_v26 = vmul.f32 -12.5, %v6459_v33  ;;  %v6762_v27 = vmul.f32 -12.5, %v6462_v34  ;;  %v6765_v28 = vmul.f32 -12.5, %v6465_v35  ;;  %v6768_v29 = vmul.f32 -12.5, %v6468_v36  ;;  %p6174_p0 = pnand %p6173_p13, %p6167_p10 }
 0x110   :  { %v6771_v30 = vmul.f32 -12.5, %v6471_v37  ;;  %v6774_v31 = vmul.f32 -12.5, %v6474_v38  ;;  %v6777_v32 = vmul.f32 -12.5, %v6477_v39  ;;  %v6780_v33 = vmul.f32 -12.5, %v6480_v40 }
 0x111   :  { %v6783_v34 = vmul.f32 -12.5, %v6483_v41  ;;  %v6786_v35 = vmul.f32 -12.5, %v6486_v42  ;;  %v6789_v36 = vmul.f32 -12.5, %v6489_v43  ;;  %v6792_v37 = vmul.f32 -12.5, %v6492_v44 }
 0x112   :  { %v6795_v38 = vmul.f32 -12.5, %v6495_v45  ;;  %v6798_v39 = vmul.f32 -12.5, %v6498_v46  ;;  %v6801_v40 = vmul.f32 -12.5, %v6501_v47  ;;  %v6804_v41 = vmul.f32 -12.5, %v6504_v48  ;;  %v7688_v46 = vld [vmem:[#allocation67_spill] sm:$0xff]  ;;  %v7690_v47 = vld [vmem:[#allocation68_spill] sm:$0xff] }
 0x113   :  { %v6807_v42 = vmul.f32 -12.5, %v6507_v49  ;;  %v6810_v43 = vmul.f32 -12.5, %v6510_v50  ;;  %v6813_v44 = vmul.f32 -12.5, %v6513_v51  ;;  %v6816_v45 = vmul.f32 -12.5, %v6516_v52  ;;  %v7692_v48 = vld [vmem:[#allocation69_spill] sm:$0xff]  ;;  %v7694_v49 = vld [vmem:[#allocation70_spill] sm:$0xff] }
 0x114   :  { %7681 = vst [vmem:[#allocation112_spill] sm:$0xff] %v6798_v39  ;;  %7682 = vst [vmem:[#allocation113_spill] sm:$0xff] %v6801_v40  ;;  %v6819_v39 = vmul.f32 -12.5, %v7688_v46  ;;  %v6822_v40 = vmul.f32 -12.5, %v7690_v47  ;;  %v7696_v50 = vld [vmem:[#allocation71_spill] sm:$0xff]  ;;  %v7698_v51 = vld [vmem:[#allocation72_spill] sm:$0xff] }
 0x115   :  { %7683 = vst [vmem:[#allocation114_spill] sm:$0xff] %v6804_v41  ;;  %7684 = vst [vmem:[#allocation115_spill] sm:$0xff] %v6807_v42  ;;  %v6825_v41 = vmul.f32 -12.5, %v7692_v48  ;;  %v6828_v42 = vmul.f32 -12.5, %v7694_v49  ;;  %v7700_v52 = vld [vmem:[#allocation73_spill] sm:$0xff]  ;;  %v7702_v46 = vld [vmem:[#allocation74_spill] sm:$0xff] }
 0x116   :  { %7685 = vst [vmem:[#allocation116_spill] sm:$0xff] %v6810_v43  ;;  %7686 = vst [vmem:[#allocation117_spill] sm:$0xff] %v6813_v44  ;;  %v6831_v43 = vmul.f32 -12.5, %v7696_v50  ;;  %v6834_v44 = vmul.f32 -12.5, %v7698_v51  ;;  %v7704_v47 = vld [vmem:[#allocation75_spill] sm:$0xff]  ;;  %v7706_v48 = vld [vmem:[#allocation76_spill] sm:$0xff] }
 0x117   :  { %7687 = vst [vmem:[#allocation118_spill] sm:$0xff] %v6816_v45  ;;  %7689 = vst [vmem:[#allocation119_spill] sm:$0xff] %v6819_v39  ;;  %v6837_v45 = vmul.f32 -12.5, %v7700_v52  ;;  %v6840_v39 = vmul.f32 -12.5, %v7702_v46  ;;  %v7708_v49 = vld [vmem:[#allocation77_spill] sm:$0xff]  ;;  %v7710_v50 = vld [vmem:[#allocation78_spill] sm:$0xff] }
 0x118   :  { %7691 = vst [vmem:[#allocation120_spill] sm:$0xff] %v6822_v40  ;;  %7693 = vst [vmem:[#allocation121_spill] sm:$0xff] %v6825_v41  ;;  %v6843_v40 = vmul.f32 -12.5, %v7704_v47  ;;  %v6846_v41 = vmul.f32 -12.5, %v7706_v48  ;;  %v7712_v51 = vld [vmem:[#allocation79_spill] sm:$0xff]  ;;  %v7714_v52 = vld [vmem:[#allocation80_spill] sm:$0xff] }
 0x119   :  { %7695 = vst [vmem:[#allocation122_spill] sm:$0xff] %v6828_v42  ;;  %7697 = vst [vmem:[#allocation123_spill] sm:$0xff] %v6831_v43  ;;  %v6849_v42 = vmul.f32 -12.5, %v7708_v49  ;;  %v6852_v43 = vmul.f32 -12.5, %v7710_v50  ;;  %v7716_v46 = vld [vmem:[#allocation81_spill] sm:$0xff]  ;;  %v7718_v47 = vld [vmem:[#allocation82_spill] sm:$0xff] }
 0x11a   :  { %7699 = vst [vmem:[#allocation124_spill] sm:$0xff] %v6834_v44  ;;  %7701 = vst [vmem:[#allocation125_spill] sm:$0xff] %v6837_v45  ;;  %v6855_v44 = vmul.f32 -12.5, %v7712_v51  ;;  %v6858_v45 = vmul.f32 -12.5, %v7714_v52  ;;  %v7720_v48 = vld [vmem:[#allocation83_spill] sm:$0xff]  ;;  %v7722_v49 = vld [vmem:[#allocation84_spill] sm:$0xff] }
 0x11b   :  { %7703 = vst [vmem:[#allocation126_spill] sm:$0xff] %v6840_v39  ;;  %7705 = vst [vmem:[#allocation127_spill] sm:$0xff] %v6843_v40  ;;  %v6861_v39 = vmul.f32 -12.5, %v7716_v46  ;;  %v6864_v40 = vmul.f32 -12.5, %v7718_v47  ;;  %v7724_v50 = vld [vmem:[#allocation85_spill] sm:$0xff]  ;;  %v7726_v51 = vld [vmem:[#allocation86_spill] sm:$0xff] }
 0x11c   :  { %7707 = vst [vmem:[#allocation128_spill] sm:$0xff] %v6846_v41  ;;  %7709 = vst [vmem:[#allocation129_spill] sm:$0xff] %v6849_v42  ;;  %v6867_v41 = vmul.f32 -12.5, %v7720_v48  ;;  %v6870_v42 = vmul.f32 -12.5, %v7722_v49  ;;  %v7728_v52 = vld [vmem:[#allocation87_spill] sm:$0xff]  ;;  %v7730_v46 = vld [vmem:[#allocation88_spill] sm:$0xff] }
 0x11d   :  { %7711 = vst [vmem:[#allocation130_spill] sm:$0xff] %v6852_v43  ;;  %7713 = vst [vmem:[#allocation131_spill] sm:$0xff] %v6855_v44  ;;  %v6873_v43 = vmul.f32 -12.5, %v7724_v50  ;;  %v6876_v44 = vmul.f32 -12.5, %v7726_v51  ;;  %v7732_v47 = vld [vmem:[#allocation89_spill] sm:$0xff]  ;;  %v7734_v48 = vld [vmem:[#allocation90_spill] sm:$0xff] }
 0x11e   :  { %7715 = vst [vmem:[#allocation132_spill] sm:$0xff] %v6858_v45  ;;  %7717 = vst [vmem:[#allocation133_spill] sm:$0xff] %v6861_v39  ;;  %v6879_v45 = vmul.f32 -12.5, %v7728_v52  ;;  %v6882_v39 = vmul.f32 -12.5, %v7730_v46  ;;  %v7736_v49 = vld [vmem:[#allocation91_spill] sm:$0xff]  ;;  %v7738_v50 = vld [vmem:[#allocation92_spill] sm:$0xff] }
 0x11f   :  { %7719 = vst [vmem:[#allocation134_spill] sm:$0xff] %v6864_v40  ;;  %7721 = vst [vmem:[#allocation135_spill] sm:$0xff] %v6867_v41  ;;  %v6885_v40 = vmul.f32 -12.5, %v7732_v47  ;;  %v6888_v41 = vmul.f32 -12.5, %v7734_v48  ;;  %v7740_v51 = vld [vmem:[#allocation93_spill] sm:$0xff]  ;;  %v7742_v52 = vld [vmem:[#allocation110_spill] sm:$0xff] }
 0x120   :  { %7723 = vst [vmem:[#allocation136_spill] sm:$0xff] %v6870_v42  ;;  %7725 = vst [vmem:[#allocation137_spill] sm:$0xff] %v6873_v43  ;;  %v6891_v42 = vmul.f32 -12.5, %v7736_v49  ;;  %v6894_v43 = vmul.f32 -12.5, %v7738_v50  ;;  %v7743_v46 = vld [vmem:[#allocation111_spill] sm:$0xff]  ;;  %v7744_v47 = vld [vmem:[#allocation12_spill] sm:$0xff] }
 0x121   :  { %7727 = vst [vmem:[#allocation138_spill] sm:$0xff] %v6876_v44  ;;  %7729 = vst [vmem:[#allocation139_spill] sm:$0xff] %v6879_v45  ;;  %v6897_v44 = vmul.f32 -12.5, %v7740_v51  ;;  %v2486_v45 = vmul.f32 %v7742_v52, %v6349_v60  ;;  %v7745_v48 = vld [vmem:[#allocation13_spill] sm:$0xff]  ;;  %v7746_v49 = vld [vmem:[#allocation14_spill] sm:$0xff] }
 0x122   :  { %7731 = vst [vmem:[#allocation140_spill] sm:$0xff] %v6882_v39  ;;  %7733 = vst [vmem:[#allocation141_spill] sm:$0xff] %v6885_v40  ;;  %v2487_v39 = vmul.f32 %v7743_v46, %v6351_v61  ;;  %v2502_v40 = vmul.f32 %v7744_v47, %v6654_v56  ;;  %v7747_v50 = vld [vmem:[#allocation15_spill] sm:$0xff]  ;;  %v7748_v51 = vld [vmem:[#allocation16_spill] sm:$0xff] }
 0x123   :  { %7735 = vst [vmem:[#allocation142_spill] sm:$0xff] %v6888_v41  ;;  %7737 = vst [vmem:[#allocation143_spill] sm:$0xff] %v6891_v42  ;;  %v2503_v41 = vmul.f32 %v7745_v48, %v6657_v57  ;;  %v2518_v42 = vmul.f32 %v7746_v49, %v6660_v58  ;;  %v7749_v60 = vld [vmem:[#allocation17_spill] sm:$0xff]  ;;  %v7750_v61 = vld [vmem:[#allocation18_spill] sm:$0xff] }
 0x124   :  { %7739 = vst [vmem:[#allocation144_spill] sm:$0xff] %v6894_v43  ;;  %7741 = vst [vmem:[#allocation145_spill] sm:$0xff] %v6897_v44  ;;  %v2519_v43 = vmul.f32 %v7747_v50, %v6663_v59  ;;  %v2534_v44 = vmul.f32 %v7748_v51, %v6666_v53  ;;  %v2535_v52 = vmul.f32 %v7749_v60, %v6669_v54  ;;  %v7751_v47 = vld [vmem:[#allocation19_spill] sm:$0xff]  ;;  %v7752_v48 = vld [vmem:[#allocation20_spill] sm:$0xff] }
 0x125   :  { %v2550_v46 = vmul.f32 %v7750_v61, %v6672_v55  ;;  %v2551_v56 = vmul.f32 %v7751_v47, %v6675_v62  ;;  %v2566_v57 = vmul.f32 %v7752_v48, %v6678_v63  ;;  %v7753_v49 = vld [vmem:[#allocation21_spill] sm:$0xff]  ;;  %v7754_v50 = vld [vmem:[#allocation22_spill] sm:$0xff]  ;;  %v7755_v51 = vld [vmem:[#allocation23_spill] sm:$0xff] }
 0x126   :  { %v2567_v58 = vmul.f32 %v7753_v49, %v6681_v0  ;;  %v2582_v59 = vmul.f32 %v7754_v50, %v6684_v1  ;;  %v2583_v53 = vmul.f32 %v7755_v51, %v6687_v2  ;;  %v7756_v54 = vld [vmem:[#allocation24_spill] sm:$0xff]  ;;  %v7757_v55 = vld [vmem:[#allocation25_spill] sm:$0xff]  ;;  %v7758_v62 = vld [vmem:[#allocation26_spill] sm:$0xff]  ;;  %v3288_v51 = vmul.f32 1.442695, %v2487_v39 }
 0x127   :  { %v2598_v60 = vmul.f32 %v7756_v54, %v6690_v3  ;;  %v2599_v61 = vmul.f32 %v7757_v55, %v6693_v4  ;;  %v6933_v47 = vmul.f32 %v7758_v62, %v6696_v5  ;;  %v7759_v63 = vld [vmem:[#allocation27_spill] sm:$0xff]  ;;  %v7760_v0 = vld [vmem:[#allocation28_spill] sm:$0xff]  ;;  %v7761_v2 = vld [vmem:[#allocation29_spill] sm:$0xff]  ;;  %v3286_v4 = vmul.f32 1.442695, %v2486_v45 }
 0x128   :  { %v6937_v48 = vmul.f32 %v7759_v63, %v6699_v6  ;;  %v6941_v1 = vmul.f32 %v7760_v0, %v6702_v7  ;;  %v6945_v49 = vmul.f32 %v7761_v2, %v6705_v8  ;;  %v7762_v3 = vld [vmem:[#allocation30_spill] sm:$0xff]  ;;  %v3318_v5 = vmul.f32 1.442695, %v2502_v40  ;;  %v7763_v54 = vld [vmem:[#allocation31_spill] sm:$0xff]  ;;  %v7764_v6 = vld [vmem:[#allocation32_spill] sm:$0xff] }
 0x129   :  { %v6949_v50 = vmul.f32 %v7762_v3, %v6708_v9  ;;  %v6953_v55 = vmul.f32 %v7763_v54, %v6711_v10  ;;  %v6957_v62 = vmul.f32 %v7764_v6, %v6714_v11  ;;  %v7765_v7 = vld [vmem:[#allocation33_spill] sm:$0xff]  ;;  %v3320_v8 = vmul.f32 1.442695, %v2503_v41  ;;  %v7766_v0 = vld [vmem:[#allocation34_spill] sm:$0xff]  ;;  %v7767_v39 = vld [vmem:[#allocation35_spill] sm:$0xff] }
 0x12a   :  { %v6961_v63 = vmul.f32 %v7765_v7, %v6717_v12  ;;  %v6965_v9 = vmul.f32 %v7766_v0, %v6720_v13  ;;  %v6969_v40 = vmul.f32 %v7767_v39, %v6723_v14  ;;  %5900 = vpow2.f32 %v3286_v4  ;;  %v7768_v45 = vld [vmem:[#allocation36_spill] sm:$0xff]  ;;  %v7769_v11 = vld [vmem:[#allocation37_spill] sm:$0xff]  ;;  %v7770_v41 = vld [vmem:[#allocation38_spill] sm:$0xff] }
 0x12b   :  { %v3350_v10 = vmul.f32 1.442695, %v2518_v42  ;;  %v6973_v2 = vmul.f32 %v7768_v45, %v6726_v15  ;;  %v6977_v3 = vmul.f32 %v7769_v11, %v6729_v16  ;;  %5902 = vpow2.f32 %v3288_v51  ;;  %v7771_v54 = vld [vmem:[#allocation39_spill] sm:$0xff]  ;;  %v7772_v4 = vld [vmem:[#allocation40_spill] sm:$0xff]  ;;  %v7773_v6 = vld [vmem:[#allocation41_spill] sm:$0xff] }
 0x12c   :  { %v3352_v12 = vmul.f32 1.442695, %v2519_v43  ;;  %v6981_v13 = vmul.f32 %v7770_v41, %v6732_v17  ;;  %v6985_v14 = vmul.f32 %v7771_v54, %v6735_v18  ;;  %5904 = vpow2.f32 %v3318_v5  ;;  %v7774_v51 = vld [vmem:[#allocation42_spill] sm:$0xff]  ;;  %v7775_v7 = vld [vmem:[#allocation43_spill] sm:$0xff]  ;;  %v7776_v5 = vld [vmem:[#allocation44_spill] sm:$0xff] }
 0x12d   :  { %v3382_v42 = vmul.f32 1.442695, %v2534_v44  ;;  %v6989_v15 = vmul.f32 %v7772_v4, %v6738_v19  ;;  %v6993_v16 = vmul.f32 %v7773_v6, %v6741_v20  ;;  %5906 = vpow2.f32 %v3320_v8  ;;  %v7777_v0 = vld [vmem:[#allocation45_spill] sm:$0xff]  ;;  %v7778_v8 = vld [vmem:[#allocation46_spill] sm:$0xff]  ;;  %v7779_v39 = vld [vmem:[#allocation47_spill] sm:$0xff] }
 0x12e   :  { %v3384_v43 = vmul.f32 1.442695, %v2535_v52  ;;  %v6997_v17 = vmul.f32 %v7774_v51, %v6744_v21  ;;  %v7001_v18 = vmul.f32 %v7775_v7, %v6747_v22  ;;  %5908 = vpow2.f32 %v3350_v10  ;;  %v7780_v10 = vld [vmem:[#allocation48_spill] sm:$0xff]  ;;  %v7781_v45 = vld [vmem:[#allocation49_spill] sm:$0xff]  ;;  %v7782_v11 = vld [vmem:[#allocation50_spill] sm:$0xff] }
 0x12f   :  { %v3414_v44 = vmul.f32 1.442695, %v2550_v46  ;;  %v7005_v19 = vmul.f32 %v7776_v5, %v6750_v23  ;;  %v7009_v20 = vmul.f32 %v7777_v0, %v6753_v24  ;;  %5910 = vpow2.f32 %v3352_v12  ;;  %v7783_v12 = vld [vmem:[#allocation51_spill] sm:$0xff]  ;;  %v7784_v41 = vld [vmem:[#allocation52_spill] sm:$0xff]  ;;  %v7785_v54 = vld [vmem:[#allocation53_spill] sm:$0xff] }
 0x130   :  { %v3416_v52 = vmul.f32 1.442695, %v2551_v56  ;;  %v7013_v21 = vmul.f32 %v7778_v8, %v6756_v25  ;;  %v7017_v22 = vmul.f32 %v7779_v39, %v6759_v26  ;;  %5912 = vpow2.f32 %v3382_v42  ;;  %v7795_v39 = vld [vmem:[#allocation61_spill] sm:$0xff] }
 0x131   :  { %v3446_v46 = vmul.f32 1.442695, %v2566_v57  ;;  %v7021_v23 = vmul.f32 %v7780_v10, %v6762_v27  ;;  %v7025_v24 = vmul.f32 %v7781_v45, %v6765_v28  ;;  %5914 = vpow2.f32 %v3384_v43  ;;  %v7788_v43 = vld [vmem:[#allocation56_spill] sm:$0xff]  ;;  %v7797_v45 = vld [vmem:[#allocation62_spill] sm:$0xff] }
 0x132   :  { %v3448_v56 = vmul.f32 1.442695, %v2567_v58  ;;  %v7029_v25 = vmul.f32 %v7782_v11, %v6768_v29  ;;  %v7033_v26 = vmul.f32 %v7783_v12, %v6771_v30  ;;  %5916 = vpow2.f32 %v3414_v44  ;;  %v7786_v29 = vld [vmem:[#allocation54_spill] sm:$0xff]  ;;  %v7787_v30 = vld [vmem:[#allocation55_spill] sm:$0xff] }
 0x133   :  { %v3478_v57 = vmul.f32 1.442695, %v2582_v59  ;;  %v7037_v27 = vmul.f32 %v7784_v41, %v6774_v31  ;;  %v7041_v28 = vmul.f32 %v7785_v54, %v6777_v32  ;;  %5918 = vpow2.f32 %v3416_v52  ;;  %v7790_v44 = vld [vmem:[#allocation58_spill] sm:$0xff]  ;;  %v7792_v52 = vld [vmem:[#allocation112_spill] sm:$0xff]  ;;  %v7799_v11 = vld [vmem:[#allocation63_spill] sm:$0xff] }
 0x134   :  { %v3480_v58 = vmul.f32 1.442695, %v2583_v53  ;;  %v7043_v42 = vpop.eup %5900  ;;  %v7047_v4 = vmul.f32 %v7786_v29, %v6780_v33  ;;  %v7051_v6 = vmul.f32 %v7787_v30, %v6783_v34  ;;  %5920 = vpow2.f32 %v3446_v46  ;;  %v7789_v53 = vld [vmem:[#allocation57_spill] sm:$0xff]  ;;  %v7800_v54 = vld [vmem:[#allocation116_spill] sm:$0xff] }
 0x135   :  { %v3510_v59 = vmul.f32 1.442695, %v2598_v60  ;;  %v7053_v31 = vpop.eup %5902  ;;  %v7057_v32 = vmul.f32 %v7788_v43, %v6786_v35  ;;  %v7061_v51 = vmul.f32 %v7789_v53, %v6789_v36  ;;  %5922 = vpow2.f32 %v3448_v56  ;;  %v7791_v60 = vld [vmem:[#allocation59_spill] sm:$0xff]  ;;  %v7793_v36 = vld [vmem:[#allocation60_spill] sm:$0xff]  ;;  %v7803_v30 = vld [vmem:[#allocation65_spill] sm:$0xff] }
 0x136   :  { %v3512_v7 = vmul.f32 1.442695, %v2599_v61  ;;  %v7063_v33 = vpop.eup %5904  ;;  %v7067_v34 = vmul.f32 %v7790_v44, %v6792_v37  ;;  %v7071_v5 = vmul.f32 %v7791_v60, %v6795_v38  ;;  %5924 = vpow2.f32 %v3478_v57  ;;  %v7794_v61 = vld [vmem:[#allocation113_spill] sm:$0xff]  ;;  %v7796_v38 = vld [vmem:[#allocation114_spill] sm:$0xff]  ;;  %v7801_v29 = vld [vmem:[#allocation64_spill] sm:$0xff] }
 0x137   :  { %v3542_v35 = vmul.f32 1.442695, %v6933_v47  ;;  %v7074_v0 = vpop.eup %5906  ;;  %v7078_v8 = vmul.f32 %v7793_v36, %v7792_v52  ;;  %v7082_v46 = vmul.f32 %v7795_v39, %v7794_v61  ;;  %5926 = vpow2.f32 %v3480_v58  ;;  %v7798_v47 = vld [vmem:[#allocation115_spill] sm:$0xff]  ;;  %v7804_v60 = vld [vmem:[#allocation118_spill] sm:$0xff] }
 0x138   :  { %v3544_v37 = vmul.f32 1.442695, %v6937_v48  ;;  %v7085_v10 = vpop.eup %5908  ;;  %v7089_v56 = vmul.f32 %v7797_v45, %v7796_v38  ;;  %v7093_v12 = vmul.f32 %v7799_v11, %v7798_v47  ;;  %5928 = vpow2.f32 %v3510_v59  ;;  %v7802_v48 = vld [vmem:[#allocation117_spill] sm:$0xff]  ;;  %v7805_v52 = vld [vmem:[#allocation66_spill] sm:$0xff]  ;;  %v7807_v36 = vld [vmem:[#allocation67_spill] sm:$0xff] }
 0x139   :  { %v3574_v57 = vmul.f32 1.442695, %v6941_v1  ;;  %v7096_v41 = vpop.eup %5910  ;;  %v7100_v58 = vmul.f32 %v7801_v29, %v7800_v54  ;;  %v7104_v43 = vmul.f32 %v7803_v30, %v7802_v48  ;;  %5930 = vpow2.f32 %v3512_v7  ;;  %v7806_v1 = vld [vmem:[#allocation119_spill] sm:$0xff]  ;;  %v7808_v45 = vld [vmem:[#allocation120_spill] sm:$0xff]  ;;  %v7811_v11 = vld [vmem:[#allocation69_spill] sm:$0xff] }
 0x13a   :  { %v3576_v53 = vmul.f32 1.442695, %v6945_v49  ;;  %v7107_v44 = vpop.eup %5912  ;;  %v7111_v59 = vmul.f32 %v7805_v52, %v7804_v60  ;;  %v7115_v61 = vmul.f32 %v7807_v36, %v7806_v1  ;;  %5932 = vpow2.f32 %v3542_v35  ;;  %v7809_v47 = vld [vmem:[#allocation68_spill] sm:$0xff]  ;;  %v7810_v49 = vld [vmem:[#allocation121_spill] sm:$0xff]  ;;  %v7812_v30 = vld [vmem:[#allocation122_spill] sm:$0xff] }
 0x13b   :  { %v3606_v39 = vmul.f32 1.442695, %v6949_v50  ;;  %v7118_v38 = vpop.eup %5914  ;;  %v7122_v7 = vmul.f32 %v7809_v47, %v7808_v45  ;;  %v7126_v54 = vmul.f32 %v7811_v11, %v7810_v49  ;;  %5934 = vpow2.f32 %v3544_v37  ;;  %v7813_v60 = vld [vmem:[#allocation70_spill] sm:$0xff]  ;;  %v7814_v50 = vld [vmem:[#allocation123_spill] sm:$0xff]  ;;  %v7816_v47 = vld [vmem:[#allocation124_spill] sm:$0xff] }
 0x13c   :  { %v3608_v29 = vmul.f32 1.442695, %v6953_v55  ;;  %v7129_v48 = vpop.eup %5916  ;;  %v7133_v35 = vmul.f32 %v7813_v60, %v7812_v30  ;;  %v7815_v52 = vld [vmem:[#allocation71_spill] sm:$0xff]  ;;  %5936 = vpow2.f32 %v3574_v57  ;;  %v3638_v36 = vmul.f32 1.442695, %v6957_v62  ;;  %v7817_v49 = vld [vmem:[#allocation72_spill] sm:$0xff] }
 0x13d   :  { %v7137_v1 = vmul.f32 %v7815_v52, %v7814_v50  ;;  %v7140_v45 = vpop.eup %5918  ;;  %v7144_v37 = vmul.f32 %v7817_v49, %v7816_v47  ;;  %5938 = vpow2.f32 %v3576_v53  ;;  %v3640_v55 = vmul.f32 1.442695, %v6961_v63 }
 0x13e   :  { %v3670_v11 = vmul.f32 1.442695, %v6965_v9  ;;  %v7148_v30 = vpop.eup %5920  ;;  %5940 = vpow2.f32 %v3606_v39  ;;  %v3672_v60 = vmul.f32 1.442695, %v6969_v40  ;;  %v3702_v57 = vmul.f32 1.442695, %v6973_v2 }
 0x13f   :  { %v3704_v62 = vmul.f32 1.442695, %v6977_v3  ;;  %v7153_v50 = vpop.eup %5922  ;;  %5942 = vpow2.f32 %v3608_v29  ;;  %v3734_v52 = vmul.f32 1.442695, %v6981_v13  ;;  %v3736_v53 = vmul.f32 1.442695, %v6985_v14 }
 0x140   :  { %v3766_v63 = vmul.f32 1.442695, %v6989_v15  ;;  %v7158_v47 = vpop.eup %5924  ;;  %5944 = vpow2.f32 %v3638_v36  ;;  %v3768_v9 = vmul.f32 1.442695, %v6993_v16  ;;  %v3798_v40 = vmul.f32 1.442695, %v6997_v17 }
 0x141   :  { %v3800_v2 = vmul.f32 1.442695, %v7001_v18  ;;  %v7163_v39 = vpop.eup %5926  ;;  %5946 = vpow2.f32 %v3640_v55  ;;  %v3830_v3 = vmul.f32 1.442695, %v7005_v19  ;;  %v3832_v13 = vmul.f32 1.442695, %v7009_v20 }
 0x142   :  { %v7168_v14 = vmul.f32 1.442695, %v7013_v21  ;;  %v7170_v15 = vpop.eup %5928  ;;  %5948 = vpow2.f32 %v3670_v11  ;;  %v7173_v29 = vmul.f32 1.442695, %v7017_v22  ;;  %v7176_v16 = vmul.f32 1.442695, %v7021_v23 }
 0x143   :  { %v7179_v17 = vmul.f32 1.442695, %v7025_v24  ;;  %v5931_v18 = vpop.eup %5930  ;;  %5950 = vpow2.f32 %v3672_v60  ;;  %v7182_v19 = vmul.f32 1.442695, %v7029_v25  ;;  %v7185_v20 = vmul.f32 1.442695, %v7033_v26 }
 0x144   :  { %v7188_v21 = vmul.f32 1.442695, %v7037_v27  ;;  %v7190_v36 = vpop.eup %5932  ;;  %5952 = vpow2.f32 %v3702_v57  ;;  %v7193_v22 = vmul.f32 1.442695, %v7041_v28  ;;  %v7196_v23 = vmul.f32 1.442695, %v7047_v4 }
 0x145   :  { %v7199_v24 = vmul.f32 1.442695, %v7051_v6  ;;  %v7201_v25 = vpop.eup %5934  ;;  %5954 = vpow2.f32 %v3704_v62  ;;  %v7204_v26 = vmul.f32 1.442695, %v7057_v32  ;;  %v7207_v27 = vmul.f32 1.442695, %v7061_v51 }
 0x146   :  { %v7210_v49 = vmul.f32 1.442695, %v7067_v34  ;;  %v7212_v28 = vpop.eup %5936  ;;  %5956 = vpow2.f32 %v3734_v52  ;;  %v7215_v4 = vmul.f32 1.442695, %v7071_v5  ;;  %v7218_v6 = vmul.f32 1.442695, %v7078_v8 }
 0x147   :  { %v7221_v55 = vmul.f32 1.442695, %v7082_v46  ;;  %v5939_v32 = vpop.eup %5938  ;;  %5958 = vpow2.f32 %v3736_v53  ;;  %v7224_v51 = vmul.f32 1.442695, %v7089_v56  ;;  %v7227_v34 = vmul.f32 1.442695, %v7093_v12 }
 0x148   :  { %v7230_v11 = vmul.f32 1.442695, %v7100_v58  ;;  %v5941_v60 = vpop.eup %5940  ;;  %5960 = vpow2.f32 %v3766_v63  ;;  %v7233_v5 = vmul.f32 1.442695, %v7104_v43  ;;  %v7236_v8 = vmul.f32 1.442695, %v7111_v59 }
 0x149   :  { %v7239_v46 = vmul.f32 1.442695, %v7115_v61  ;;  %v5943_v57 = vpop.eup %5942  ;;  %5962 = vpow2.f32 %v3768_v9  ;;  %v7242_v56 = vmul.f32 1.442695, %v7122_v7  ;;  %v4886_v12 = vpack.c.bf16 %v7053_v31, %v7043_v42 }
 0x14a   :  { %v4894_v58 = vpack.c.bf16 %v7074_v0, %v7063_v33  ;;  %v7248_v62 = vpop.eup %5944  ;;  %5964 = vpow2.f32 %v3798_v40  ;;  %v4902_v43 = vpack.c.bf16 %v7096_v41, %v7085_v10  ;;  %v4910_v59 = vpack.c.bf16 %v7118_v38, %v7107_v44 }
 0x14b   :  { %v4918_v61 = vpack.c.bf16 %v7140_v45, %v7129_v48  ;;  %v5947_v7 = vpop.eup %5946  ;;  %5966 = vpow2.f32 %v3800_v2  ;;  %v4926_v42 = vpack.c.bf16 %v7153_v50, %v7148_v30  ;;  %v4934_v31 = vpack.c.bf16 %v7163_v39, %v7158_v47  ;;  %5286 = vst [vmem:[#allocation8] sm:$0xff] %v4886_v12 }
 0x14c   :  { %v4942_v33 = vpack.c.bf16 %v5931_v18, %v7170_v15  ;;  %5294 = vst [vmem:[#allocation8 + $0x40] sm:$0xff] %v4894_v58  ;;  %v7261_v0 = vpop.eup %5948  ;;  %5968 = vpow2.f32 %v3830_v3  ;;  %v4950_v10 = vpack.c.bf16 %v7201_v25, %v7190_v36  ;;  %v4958_v41 = vpack.c.bf16 %v5939_v32, %v7212_v28  ;;  %5302 = vst [vmem:[#allocation8 + $0x80] sm:$0xff] %v4902_v43 }
 0x14d   :  { %v4966_v44 = vpack.c.bf16 %v5943_v57, %v5941_v60  ;;  %5310 = vst [vmem:[#allocation8 + $0xc0] sm:$0xff] %v4910_v59  ;;  %5318 = vst [vmem:[#allocation8 + $0x100] sm:$0xff] %v4918_v61  ;;  %v7266_v38 = vpop.eup %5950  ;;  %5970 = vpow2.f32 %v3832_v13  ;;  %v4974_v48 = vpack.c.bf16 %v5947_v7, %v7248_v62  ;;  %v6203_v50 = vmov 1.0|1.0  }
 0x14e   :  { %5326 = vst [vmem:[#allocation8 + $0x140] sm:$0xff] %v4926_v42  ;;  %5334 = vst [vmem:[#allocation8 + $0x180] sm:$0xff] %v4934_v31  ;;  %v7269_v45 = vpop.eup %5952  ;;  %5972 = vpow2.f32 %v7168_v14  ;;  %v4982_v30 = vpack.c.bf16 %v7266_v38, %v7261_v0  ;;  %v6204_v52 = vmov 0.99609375|0.99609375   ;;  %v6205_v63 = vmov 0.98046875|0.98046875  }
 0x14f   :  { %5342 = vst [vmem:[#allocation8 + $0x1c0] sm:$0xff] %v4942_v33  ;;  %5287 = vst [vmem:[#allocation8 + $0x8] sm:$0xff] %v6203_v50  ;;  %v7274_v53 = vpop.eup %5954  ;;  %5974 = vpow2.f32 %v7173_v29  ;;  %v6206_v47 = vmov 0.953125|0.953125   ;;  %v6207_v2 = vmov 0.921875|0.921875  }
 0x150   :  { %5288 = vst [vmem:[#allocation8 + $0x10] sm:$0xff] %v6203_v50  ;;  %5289 = vst [vmem:[#allocation8 + $0x18] sm:$0xff] %v6203_v50  ;;  %v7277_v9 = vpop.eup %5956  ;;  %5976 = vpow2.f32 %v7176_v16  ;;  %v4990_v40 = vpack.c.bf16 %v7274_v53, %v7269_v45  ;;  %v6208_v39 = vmov 0.87890625|0.87890625   ;;  %v6209_v3 = vmov 0.828125|0.828125  }
 0x151   :  { %5290 = vst [vmem:[#allocation8 + $0x20] sm:$0xff] %v6203_v50  ;;  %5291 = vst [vmem:[#allocation8 + $0x28] sm:$0xff] %v6203_v50  ;;  %v7285_v13 = vpop.eup %5958  ;;  %5978 = vpow2.f32 %v7179_v17  ;;  %v6210_v14 = vmov 0.7734375|0.7734375   ;;  %v6211_v15 = vmov 0.71484375|0.71484375  }
 0x152   :  { %5292 = vst [vmem:[#allocation8 + $0x30] sm:$0xff] %v6203_v50  ;;  %5293 = vst [vmem:[#allocation8 + $0x38] sm:$0xff] %v6203_v50  ;;  %v7288_v29 = vpop.eup %5960  ;;  %5980 = vpow2.f32 %v7182_v19  ;;  %v4998_v16 = vpack.c.bf16 %v7285_v13, %v7277_v9  ;;  %v6212_v17 = vmov 0.65625|0.65625   ;;  %v6213_v18 = vmov 0.59375|0.59375  }
 0x153   :  { %5295 = vst [vmem:[#allocation8 + $0x48] sm:$0xff] %v6204_v52  ;;  %5296 = vst [vmem:[#allocation8 + $0x50] sm:$0xff] %v6204_v52  ;;  %v6214_v19 = vmov 0.53125|0.53125   ;;  %v7296_v36 = vpop.eup %5962  ;;  %5982 = vpow2.f32 %v7185_v20  ;;  %v6215_v25 = vmov 0.47265625|0.47265625  }
 0x154   :  { %5297 = vst [vmem:[#allocation8 + $0x58] sm:$0xff] %v6204_v52  ;;  %5298 = vst [vmem:[#allocation8 + $0x60] sm:$0xff] %v6204_v52  ;;  %v6216_v28 = vmov 0.4140625|0.4140625   ;;  %v7299_v32 = vpop.eup %5964  ;;  %5984 = vpow2.f32 %v7188_v21  ;;  %v5006_v20 = vpack.c.bf16 %v7296_v36, %v7288_v29  ;;  %v6217_v60 = vmov 0.36132813|0.36132813  }
 0x155   :  { %5299 = vst [vmem:[#allocation8 + $0x68] sm:$0xff] %v6204_v52  ;;  %5300 = vst [vmem:[#allocation8 + $0x70] sm:$0xff] %v6204_v52  ;;  %v6218_v57 = vmov 0.31054688|0.31054688   ;;  %v6219_v21 = vmov 0.26367188|0.26367188   ;;  %v7304_v12 = vpop.eup %5966  ;;  %5986 = vpow2.f32 %v7193_v22 }
 0x156   :  { %5301 = vst [vmem:[#allocation8 + $0x78] sm:$0xff] %v6204_v52  ;;  %5350 = vst [vmem:[#allocation8 + $0x200] sm:$0xff] %v4950_v10  ;;  %v6220_v58 = vmov 0.22167969|0.22167969   ;;  %v6221_v62 = vmov 0.18554688|0.18554688   ;;  %v7307_v43 = vpop.eup %5968  ;;  %5988 = vpow2.f32 %v7196_v23  ;;  %v5014_v22 = vpack.c.bf16 %v7304_v12, %v7299_v32 }
 0x157   :  { %5358 = vst [vmem:[#allocation8 + $0x240] sm:$0xff] %v4958_v41  ;;  %5366 = vst [vmem:[#allocation8 + $0x280] sm:$0xff] %v4966_v44  ;;  %v6222_v59 = vmov 0.15234375|0.15234375   ;;  %v6223_v61 = vmov 0.12451172|0.12451172   ;;  %v7312_v7 = vpop.eup %5970  ;;  %5990 = vpow2.f32 %v7199_v24 }
 0x158   :  { %5303 = vst [vmem:[#allocation8 + $0x88] sm:$0xff] %v6205_v63  ;;  %5304 = vst [vmem:[#allocation8 + $0x90] sm:$0xff] %v6205_v63  ;;  %v6224_v23 = vmov 0.10058594|0.10058594   ;;  %v6225_v42 = vmov 0.080566406|0.080566406   ;;  %v7315_v33 = vpop.eup %5972  ;;  %5992 = vpow2.f32 %v7204_v26  ;;  %v5022_v24 = vpack.c.bf16 %v7312_v7, %v7307_v43 }
 0x159   :  { %5305 = vst [vmem:[#allocation8 + $0x98] sm:$0xff] %v6205_v63  ;;  %5306 = vst [vmem:[#allocation8 + $0xa0] sm:$0xff] %v6205_v63  ;;  %v6226_v31 = vmov 0.06347656|0.06347656   ;;  %v6227_v0 = vmov 0.049804688|0.049804688   ;;  %v7320_v41 = vpop.eup %5974  ;;  %5994 = vpow2.f32 %v7207_v27 }
 0x15a   :  { %5307 = vst [vmem:[#allocation8 + $0xa8] sm:$0xff] %v6205_v63  ;;  %5308 = vst [vmem:[#allocation8 + $0xb0] sm:$0xff] %v6205_v63  ;;  %v6228_v10 = vmov 0.03857422|0.03857422   ;;  %v6229_v26 = vmov 0.029663086|0.029663086   ;;  %5996 = vpow2.f32 %v7210_v49  ;;  %v5030_v27 = vpack.c.bf16 %v7320_v41, %v7315_v33 }
 0x15b   :  { %5309 = vst [vmem:[#allocation8 + $0xb8] sm:$0xff] %v6205_v63  ;;  %5311 = vst [vmem:[#allocation8 + $0xc8] sm:$0xff] %v6206_v47  ;;  %v6230_v44 = vmov 0.022460938|0.022460938   ;;  %v6231_v38 = vmov 0.016845703|0.016845703   ;;  %5998 = vpow2.f32 %v7215_v4 }
 0x15c   :  { %5312 = vst [vmem:[#allocation8 + $0xd0] sm:$0xff] %v6206_v47  ;;  %5313 = vst [vmem:[#allocation8 + $0xd8] sm:$0xff] %v6206_v47  ;;  %v6232_v45 = vmov 0.012573242|0.012573242   ;;  %v6234_v49 = vmov 0.006713867|0.006713867   ;;  %6000 = vpow2.f32 %v7218_v6 }
 0x15d   :  { %5314 = vst [vmem:[#allocation8 + $0xe0] sm:$0xff] %v6206_v47  ;;  %5315 = vst [vmem:[#allocation8 + $0xe8] sm:$0xff] %v6206_v47  ;;  %v6235_v52 = vmov 0.004852295|0.004852295   ;;  %v6236_v53 = vmov 0.0034484863|0.0034484863   ;;  %6002 = vpow2.f32 %v7221_v55 }
 0x15e   :  { %5316 = vst [vmem:[#allocation8 + $0xf0] sm:$0xff] %v6206_v47  ;;  %5317 = vst [vmem:[#allocation8 + $0xf8] sm:$0xff] %v6206_v47  ;;  %v6237_v47 = vmov 0.0024261475|0.0024261475   ;;  %v6238_v9 = vmov 0.001701355|0.001701355   ;;  %6004 = vpow2.f32 %v7224_v51 }
 0x15f   :  { %5374 = vst [vmem:[#allocation8 + $0x2c0] sm:$0xff] %v4974_v48  ;;  %5319 = vst [vmem:[#allocation8 + $0x108] sm:$0xff] %v6207_v2  ;;  %v7323_v48 = vpop.eup %5976  ;;  %v6239_v6 = vmov 0.0011749268|0.0011749268   ;;  %v6242_v13 = vmov 0.0003643036|0.0003643036   ;;  %6006 = vpow2.f32 %v7227_v34 }
 0x160   :  { %5320 = vst [vmem:[#allocation8 + $0x110] sm:$0xff] %v6207_v2  ;;  %5321 = vst [vmem:[#allocation8 + $0x118] sm:$0xff] %v6207_v2  ;;  %v7328_v50 = vpop.eup %5978  ;;  %v6244_v51 = vmov 0.00015830994|0.00015830994   ;;  %v6245_v29 = vmov 0.00010251999|0.00010251999   ;;  %6008 = vpow2.f32 %v7230_v11 }
 0x161   :  { %5322 = vst [vmem:[#allocation8 + $0x120] sm:$0xff] %v6207_v2  ;;  %5323 = vst [vmem:[#allocation8 + $0x128] sm:$0xff] %v6207_v2  ;;  %v7331_v63 = vpop.eup %5980  ;;  %v5038_v4 = vpack.c.bf16 %v7328_v50, %v7323_v48  ;;  %v6249_v11 = vmov 1.6450882e-05|1.6450882e-05   ;;  %6010 = vpow2.f32 %v7233_v5  ;;  %v7820_v5 = vld [vmem:[#allocation126_spill] sm:$0xff]  ;;  %v7824_v7 = vld [vmem:[#allocation75_spill] sm:$0xff] }
 0x162   :  { %5324 = vst [vmem:[#allocation8 + $0x130] sm:$0xff] %v6207_v2  ;;  %5325 = vst [vmem:[#allocation8 + $0x138] sm:$0xff] %v6207_v2  ;;  %v6240_v2 = vmov 0.0008010864|0.0008010864   ;;  %v7821_v12 = vld [vmem:[#allocation74_spill] sm:$0xff]  ;;  %6012 = vpow2.f32 %v7236_v8  ;;  %v7826_v33 = vld [vmem:[#allocation76_spill] sm:$0xff] }
 0x163   :  { %5327 = vst [vmem:[#allocation8 + $0x148] sm:$0xff] %v6208_v39  ;;  %5328 = vst [vmem:[#allocation8 + $0x150] sm:$0xff] %v6208_v39  ;;  %v6252_v43 = vmov 3.7252903e-06|3.7252903e-06   ;;  %v7827_v41 = vld [vmem:[#allocation95_spill] sm:$0xff]  ;;  %v7829_v48 = vld [vmem:[#allocation77_spill] sm:$0xff] }
 0x164   :  { %5329 = vst [vmem:[#allocation8 + $0x158] sm:$0xff] %v6208_v39  ;;  %5330 = vst [vmem:[#allocation8 + $0x160] sm:$0xff] %v6208_v39 }
 0x165   :  { %5331 = vst [vmem:[#allocation8 + $0x168] sm:$0xff] %v6208_v39  ;;  %5332 = vst [vmem:[#allocation8 + $0x170] sm:$0xff] %v6208_v39 }
 0x166   :  { %5333 = vst [vmem:[#allocation8 + $0x178] sm:$0xff] %v6208_v39  ;;  %5335 = vst [vmem:[#allocation8 + $0x188] sm:$0xff] %v6209_v3  ;;  %v6241_v39 = vmov 0.000541687|0.000541687  }
 0x167   :  { %5336 = vst [vmem:[#allocation8 + $0x190] sm:$0xff] %v6209_v3  ;;  %5337 = vst [vmem:[#allocation8 + $0x198] sm:$0xff] %v6209_v3 }
 0x168   :  { %5338 = vst [vmem:[#allocation8 + $0x1a0] sm:$0xff] %v6209_v3  ;;  %5339 = vst [vmem:[#allocation8 + $0x1a8] sm:$0xff] %v6209_v3 }
 0x169   :  { %5340 = vst [vmem:[#allocation8 + $0x1b0] sm:$0xff] %v6209_v3  ;;  %5341 = vst [vmem:[#allocation8 + $0x1b8] sm:$0xff] %v6209_v3 }
 0x16a   :  { %5382 = vst [vmem:[#allocation8 + $0x300] sm:$0xff] %v4982_v30  ;;  %5343 = vst [vmem:[#allocation8 + $0x1c8] sm:$0xff] %v6210_v14  ;;  %v6233_v30 = vmov 0.009216309|0.009216309  }
 0x16b   :  { %5344 = vst [vmem:[#allocation8 + $0x1d0] sm:$0xff] %v6210_v14  ;;  %5345 = vst [vmem:[#allocation8 + $0x1d8] sm:$0xff] %v6210_v14 }
 0x16c   :  { %5346 = vst [vmem:[#allocation8 + $0x1e0] sm:$0xff] %v6210_v14  ;;  %5347 = vst [vmem:[#allocation8 + $0x1e8] sm:$0xff] %v6210_v14 }
 0x16d   :  { %5348 = vst [vmem:[#allocation8 + $0x1f0] sm:$0xff] %v6210_v14  ;;  %5349 = vst [vmem:[#allocation8 + $0x1f8] sm:$0xff] %v6210_v14  ;;  %v6243_v14 = vmov 0.0002412796|0.0002412796  }
 0x16e   :  { %5351 = vst [vmem:[#allocation8 + $0x208] sm:$0xff] %v6211_v15  ;;  %5352 = vst [vmem:[#allocation8 + $0x210] sm:$0xff] %v6211_v15 }
 0x16f   :  { %5353 = vst [vmem:[#allocation8 + $0x218] sm:$0xff] %v6211_v15  ;;  %5354 = vst [vmem:[#allocation8 + $0x220] sm:$0xff] %v6211_v15 }
 0x170   :  { %5355 = vst [vmem:[#allocation8 + $0x228] sm:$0xff] %v6211_v15  ;;  %5356 = vst [vmem:[#allocation8 + $0x230] sm:$0xff] %v6211_v15 }
 0x171   :  { %5357 = vst [vmem:[#allocation8 + $0x238] sm:$0xff] %v6211_v15  ;;  %5359 = vst [vmem:[#allocation8 + $0x248] sm:$0xff] %v6212_v17 }
 0x172   :  { %5360 = vst [vmem:[#allocation8 + $0x250] sm:$0xff] %v6212_v17  ;;  %5361 = vst [vmem:[#allocation8 + $0x258] sm:$0xff] %v6212_v17 }
 0x173   :  { %5362 = vst [vmem:[#allocation8 + $0x260] sm:$0xff] %v6212_v17  ;;  %5363 = vst [vmem:[#allocation8 + $0x268] sm:$0xff] %v6212_v17 }
 0x174   :  { %5364 = vst [vmem:[#allocation8 + $0x270] sm:$0xff] %v6212_v17  ;;  %5365 = vst [vmem:[#allocation8 + $0x278] sm:$0xff] %v6212_v17 }
 0x175   :  { %5367 = vst [vmem:[#allocation8 + $0x288] sm:$0xff] %v6213_v18  ;;  %5368 = vst [vmem:[#allocation8 + $0x290] sm:$0xff] %v6213_v18 }
 0x176   :  { %5369 = vst [vmem:[#allocation8 + $0x298] sm:$0xff] %v6213_v18  ;;  %5370 = vst [vmem:[#allocation8 + $0x2a0] sm:$0xff] %v6213_v18 }
 0x177   :  { %5371 = vst [vmem:[#allocation8 + $0x2a8] sm:$0xff] %v6213_v18  ;;  %5372 = vst [vmem:[#allocation8 + $0x2b0] sm:$0xff] %v6213_v18 }
 0x178   :  { %5373 = vst [vmem:[#allocation8 + $0x2b8] sm:$0xff] %v6213_v18  ;;  %5375 = vst [vmem:[#allocation8 + $0x2c8] sm:$0xff] %v6214_v19  ;;  %v6247_v18 = vmov 4.196167e-05|4.196167e-05  }
 0x179   :  { %5376 = vst [vmem:[#allocation8 + $0x2d0] sm:$0xff] %v6214_v19  ;;  %5377 = vst [vmem:[#allocation8 + $0x2d8] sm:$0xff] %v6214_v19 }
 0x17a   :  { %5378 = vst [vmem:[#allocation8 + $0x2e0] sm:$0xff] %v6214_v19  ;;  %5379 = vst [vmem:[#allocation8 + $0x2e8] sm:$0xff] %v6214_v19 }
 0x17b   :  { %5380 = vst [vmem:[#allocation8 + $0x2f0] sm:$0xff] %v6214_v19  ;;  %5381 = vst [vmem:[#allocation8 + $0x2f8] sm:$0xff] %v6214_v19  ;;  %v6248_v19 = vmov 2.6345253e-05|2.6345253e-05  }
 0x17c   :  { %5390 = vst [vmem:[#allocation8 + $0x340] sm:$0xff] %v4990_v40  ;;  %5383 = vst [vmem:[#allocation8 + $0x308] sm:$0xff] %v6215_v25  ;;  %v7336_v40 = vpop.eup %5982  ;;  %6014 = vpow2.f32 %v7239_v46 }
 0x17d   :  { %5384 = vst [vmem:[#allocation8 + $0x310] sm:$0xff] %v6215_v25  ;;  %5385 = vst [vmem:[#allocation8 + $0x318] sm:$0xff] %v6215_v25  ;;  %v7339_v3 = vpop.eup %5984  ;;  %v5046_v55 = vpack.c.bf16 %v7336_v40, %v7331_v63  ;;  %6016 = vpow2.f32 %v7242_v56  ;;  %v7833_v63 = vld [vmem:[#allocation131_spill] sm:$0xff]  ;;  %v7835_v40 = vld [vmem:[#allocation132_spill] sm:$0xff] }
 0x17e   :  { %5386 = vst [vmem:[#allocation8 + $0x320] sm:$0xff] %v6215_v25  ;;  %5387 = vst [vmem:[#allocation8 + $0x328] sm:$0xff] %v6215_v25  ;;  %v7344_v15 = vpop.eup %5986 }
 0x17f   :  { %5388 = vst [vmem:[#allocation8 + $0x330] sm:$0xff] %v6215_v25  ;;  %5389 = vst [vmem:[#allocation8 + $0x338] sm:$0xff] %v6215_v25  ;;  %v7347_v17 = vpop.eup %5988  ;;  %v5054_v34 = vpack.c.bf16 %v7344_v15, %v7339_v3  ;;  %v7818_v25 = vld [vmem:[#allocation125_spill] sm:$0xff] }
 0x180   :  { %5391 = vst [vmem:[#allocation8 + $0x348] sm:$0xff] %v6216_v28  ;;  %5392 = vst [vmem:[#allocation8 + $0x350] sm:$0xff] %v6216_v28  ;;  %v5991_v36 = vpop.eup %5990  ;;  %v7838_v15 = vld [vmem:[#allocation133_spill] sm:$0xff] }
 0x181   :  { %5393 = vst [vmem:[#allocation8 + $0x358] sm:$0xff] %v6216_v28  ;;  %5394 = vst [vmem:[#allocation8 + $0x360] sm:$0xff] %v6216_v28 }
 0x182   :  { %5395 = vst [vmem:[#allocation8 + $0x368] sm:$0xff] %v6216_v28  ;;  %5396 = vst [vmem:[#allocation8 + $0x370] sm:$0xff] %v6216_v28 }
 0x183   :  { %5397 = vst [vmem:[#allocation8 + $0x378] sm:$0xff] %v6216_v28  ;;  %5398 = vst [vmem:[#allocation8 + $0x380] sm:$0xff] %v4998_v16  ;;  %v6246_v16 = vmov 6.580353e-05|6.580353e-05   ;;  %v7819_v28 = vld [vmem:[#allocation73_spill] sm:$0xff] }
 0x184   :  { %5399 = vst [vmem:[#allocation8 + $0x388] sm:$0xff] %v6217_v60  ;;  %5400 = vst [vmem:[#allocation8 + $0x390] sm:$0xff] %v6217_v60  ;;  %v2983_v32 = vmul.f32 %v7819_v28, %v7818_v25 }
 0x185   :  { %5401 = vst [vmem:[#allocation8 + $0x398] sm:$0xff] %v6217_v60  ;;  %5402 = vst [vmem:[#allocation8 + $0x3a0] sm:$0xff] %v6217_v60 }
 0x186   :  { %5403 = vst [vmem:[#allocation8 + $0x3a8] sm:$0xff] %v6217_v60  ;;  %5404 = vst [vmem:[#allocation8 + $0x3b0] sm:$0xff] %v6217_v60  ;;  %v4280_v46 = vmul.f32 1.442695, %v2983_v32  ;;  %v7842_v32 = vld [vmem:[#allocation98_spill] sm:$0xff] }
 0x187   :  { %5405 = vst [vmem:[#allocation8 + $0x3b8] sm:$0xff] %v6217_v60  ;;  %5407 = vst [vmem:[#allocation8 + $0x3c8] sm:$0xff] %v6218_v57  ;;  %v6250_v60 = vmov 1.013279e-05|1.013279e-05  }
 0x188   :  { %5408 = vst [vmem:[#allocation8 + $0x3d0] sm:$0xff] %v6218_v57  ;;  %5409 = vst [vmem:[#allocation8 + $0x3d8] sm:$0xff] %v6218_v57 }
 0x189   :  { %5410 = vst [vmem:[#allocation8 + $0x3e0] sm:$0xff] %v6218_v57  ;;  %5411 = vst [vmem:[#allocation8 + $0x3e8] sm:$0xff] %v6218_v57 }
 0x18a   :  { %5412 = vst [vmem:[#allocation8 + $0x3f0] sm:$0xff] %v6218_v57  ;;  %5413 = vst [vmem:[#allocation8 + $0x3f8] sm:$0xff] %v6218_v57  ;;  %v6251_v57 = vmov 6.1690807e-06|6.1690807e-06  }
 0x18b   :  { %5415 = vst [vmem:[#allocation8 + $0x408] sm:$0xff] %v6219_v21  ;;  %5416 = vst [vmem:[#allocation8 + $0x410] sm:$0xff] %v6219_v21 }
 0x18c   :  { %5417 = vst [vmem:[#allocation8 + $0x418] sm:$0xff] %v6219_v21  ;;  %5418 = vst [vmem:[#allocation8 + $0x420] sm:$0xff] %v6219_v21 }
 0x18d   :  { %5419 = vst [vmem:[#allocation8 + $0x428] sm:$0xff] %v6219_v21  ;;  %5420 = vst [vmem:[#allocation8 + $0x430] sm:$0xff] %v6219_v21 }
 0x18e   :  { %5421 = vst [vmem:[#allocation8 + $0x438] sm:$0xff] %v6219_v21  ;;  %5423 = vst [vmem:[#allocation8 + $0x448] sm:$0xff] %v6220_v58  ;;  %v5993_v21 = vpop.eup %5992 }
 0x18f   :  { %5424 = vst [vmem:[#allocation8 + $0x450] sm:$0xff] %v6220_v58  ;;  %5425 = vst [vmem:[#allocation8 + $0x458] sm:$0xff] %v6220_v58 }
 0x190   :  { %5426 = vst [vmem:[#allocation8 + $0x460] sm:$0xff] %v6220_v58  ;;  %5427 = vst [vmem:[#allocation8 + $0x468] sm:$0xff] %v6220_v58 }
 0x191   :  { %5428 = vst [vmem:[#allocation8 + $0x470] sm:$0xff] %v6220_v58  ;;  %5429 = vst [vmem:[#allocation8 + $0x478] sm:$0xff] %v6220_v58  ;;  %v4246_v58 = vmul.f32 1.442695, %v7133_v35  ;;  %v4248_v35 = vmul.f32 1.442695, %v7137_v1 }
 0x192   :  { %5431 = vst [vmem:[#allocation8 + $0x488] sm:$0xff] %v6221_v62  ;;  %5432 = vst [vmem:[#allocation8 + $0x490] sm:$0xff] %v6221_v62 }
 0x193   :  { %5433 = vst [vmem:[#allocation8 + $0x498] sm:$0xff] %v6221_v62  ;;  %5434 = vst [vmem:[#allocation8 + $0x4a0] sm:$0xff] %v6221_v62 }
 0x194   :  { %5435 = vst [vmem:[#allocation8 + $0x4a8] sm:$0xff] %v6221_v62  ;;  %5436 = vst [vmem:[#allocation8 + $0x4b0] sm:$0xff] %v6221_v62 }
 0x195   :  { %5437 = vst [vmem:[#allocation8 + $0x4b8] sm:$0xff] %v6221_v62  ;;  %5406 = vst [vmem:[#allocation8 + $0x3c0] sm:$0xff] %v5006_v20  ;;  %v4216_v20 = vmul.f32 1.442695, %v7126_v54  ;;  %v2998_v54 = vmul.f32 %v7821_v12, %v7820_v5  ;;  %v5062_v62 = vpack.c.bf16 %v5991_v36, %v7347_v17 }
 0x196   :  { %5439 = vst [vmem:[#allocation8 + $0x4c8] sm:$0xff] %v6222_v59  ;;  %5440 = vst [vmem:[#allocation8 + $0x4d0] sm:$0xff] %v6222_v59 }
 0x197   :  { %5441 = vst [vmem:[#allocation8 + $0x4d8] sm:$0xff] %v6222_v59  ;;  %5442 = vst [vmem:[#allocation8 + $0x4e0] sm:$0xff] %v6222_v59  ;;  %6018 = vpow2.f32 %v4216_v20  ;;  %v4310_v50 = vmul.f32 1.442695, %v2998_v54  ;;  %v7394_v20 = vmul.f32 -12.5, %v7842_v32  ;;  %v7845_v54 = vld [vmem:[#allocation136_spill] sm:$0xff] }
 0x198   :  { %5443 = vst [vmem:[#allocation8 + $0x4e8] sm:$0xff] %v6222_v59  ;;  %5444 = vst [vmem:[#allocation8 + $0x4f0] sm:$0xff] %v6222_v59  ;;  %6020 = vpow2.f32 %v4246_v58  ;;  %v7846_v58 = vld [vmem:[#allocation84_spill] sm:$0xff] }
 0x199   :  { %5445 = vst [vmem:[#allocation8 + $0x4f8] sm:$0xff] %v6222_v59  ;;  %5447 = vst [vmem:[#allocation8 + $0x508] sm:$0xff] %v6223_v61  ;;  %v7822_v59 = vld [vmem:[#allocation94_spill] sm:$0xff]  ;;  %6022 = vpow2.f32 %v4248_v35  ;;  %v7848_v35 = vld [vmem:[#allocation137_spill] sm:$0xff] }
 0x19a   :  { %5448 = vst [vmem:[#allocation8 + $0x510] sm:$0xff] %v6223_v61  ;;  %5449 = vst [vmem:[#allocation8 + $0x518] sm:$0xff] %v6223_v61 }
 0x19b   :  { %5450 = vst [vmem:[#allocation8 + $0x520] sm:$0xff] %v6223_v61  ;;  %5451 = vst [vmem:[#allocation8 + $0x528] sm:$0xff] %v6223_v61 }
 0x19c   :  { %5452 = vst [vmem:[#allocation8 + $0x530] sm:$0xff] %v6223_v61  ;;  %5453 = vst [vmem:[#allocation8 + $0x538] sm:$0xff] %v6223_v61  ;;  %v7362_v61 = vmul.f32 -12.5, %v7822_v59 }
 0x19d   :  { %5455 = vst [vmem:[#allocation8 + $0x548] sm:$0xff] %v6224_v23  ;;  %5456 = vst [vmem:[#allocation8 + $0x550] sm:$0xff] %v6224_v23 }
 0x19e   :  { %5457 = vst [vmem:[#allocation8 + $0x558] sm:$0xff] %v6224_v23  ;;  %5458 = vst [vmem:[#allocation8 + $0x560] sm:$0xff] %v6224_v23 }
 0x19f   :  { %5459 = vst [vmem:[#allocation8 + $0x568] sm:$0xff] %v6224_v23  ;;  %5460 = vst [vmem:[#allocation8 + $0x570] sm:$0xff] %v6224_v23 }
 0x1a0   :  { %5461 = vst [vmem:[#allocation8 + $0x578] sm:$0xff] %v6224_v23  ;;  %5463 = vst [vmem:[#allocation8 + $0x588] sm:$0xff] %v6225_v42  ;;  %v7823_v23 = vld [vmem:[#allocation127_spill] sm:$0xff] }
 0x1a1   :  { %5464 = vst [vmem:[#allocation8 + $0x590] sm:$0xff] %v6225_v42  ;;  %5465 = vst [vmem:[#allocation8 + $0x598] sm:$0xff] %v6225_v42  ;;  %v2999_v8 = vmul.f32 %v7824_v7, %v7823_v23  ;;  %v7847_v7 = vld [vmem:[#allocation99_spill] sm:$0xff] }
 0x1a2   :  { %5466 = vst [vmem:[#allocation8 + $0x5a0] sm:$0xff] %v6225_v42  ;;  %5467 = vst [vmem:[#allocation8 + $0x5a8] sm:$0xff] %v6225_v42 }
 0x1a3   :  { %5468 = vst [vmem:[#allocation8 + $0x5b0] sm:$0xff] %v6225_v42  ;;  %5469 = vst [vmem:[#allocation8 + $0x5b8] sm:$0xff] %v6225_v42 }
 0x1a4   :  { %5471 = vst [vmem:[#allocation8 + $0x5c8] sm:$0xff] %v6226_v31  ;;  %5472 = vst [vmem:[#allocation8 + $0x5d0] sm:$0xff] %v6226_v31 }
 0x1a5   :  { %5473 = vst [vmem:[#allocation8 + $0x5d8] sm:$0xff] %v6226_v31  ;;  %5474 = vst [vmem:[#allocation8 + $0x5e0] sm:$0xff] %v6226_v31 }
 0x1a6   :  { %5475 = vst [vmem:[#allocation8 + $0x5e8] sm:$0xff] %v6226_v31  ;;  %5476 = vst [vmem:[#allocation8 + $0x5f0] sm:$0xff] %v6226_v31 }
 0x1a7   :  { %5477 = vst [vmem:[#allocation8 + $0x5f8] sm:$0xff] %v6226_v31  ;;  %5414 = vst [vmem:[#allocation8 + $0x400] sm:$0xff] %v5014_v22  ;;  %v5995_v22 = vpop.eup %5994  ;;  %v7825_v31 = vld [vmem:[#allocation128_spill] sm:$0xff] }
 0x1a8   :  { %5479 = vst [vmem:[#allocation8 + $0x608] sm:$0xff] %v6227_v0  ;;  %5480 = vst [vmem:[#allocation8 + $0x610] sm:$0xff] %v6227_v0  ;;  %v5997_v42 = vpop.eup %5996 }
 0x1a9   :  { %5481 = vst [vmem:[#allocation8 + $0x618] sm:$0xff] %v6227_v0  ;;  %5482 = vst [vmem:[#allocation8 + $0x620] sm:$0xff] %v6227_v0 }
 0x1aa   :  { %5483 = vst [vmem:[#allocation8 + $0x628] sm:$0xff] %v6227_v0  ;;  %5484 = vst [vmem:[#allocation8 + $0x630] sm:$0xff] %v6227_v0 }
 0x1ab   :  { %5485 = vst [vmem:[#allocation8 + $0x638] sm:$0xff] %v6227_v0  ;;  %5487 = vst [vmem:[#allocation8 + $0x648] sm:$0xff] %v6228_v10  ;;  %v4278_v0 = vmul.f32 1.442695, %v7144_v37 }
 0x1ac   :  { %5488 = vst [vmem:[#allocation8 + $0x650] sm:$0xff] %v6228_v10  ;;  %5489 = vst [vmem:[#allocation8 + $0x658] sm:$0xff] %v6228_v10 }
 0x1ad   :  { %5490 = vst [vmem:[#allocation8 + $0x660] sm:$0xff] %v6228_v10  ;;  %5491 = vst [vmem:[#allocation8 + $0x668] sm:$0xff] %v6228_v10  ;;  %6024 = vpow2.f32 %v4278_v0  ;;  %v7850_v0 = vld [vmem:[#allocation138_spill] sm:$0xff] }
 0x1ae   :  { %5492 = vst [vmem:[#allocation8 + $0x670] sm:$0xff] %v6228_v10  ;;  %5493 = vst [vmem:[#allocation8 + $0x678] sm:$0xff] %v6228_v10  ;;  %v5070_v10 = vpack.c.bf16 %v5995_v22, %v5993_v21  ;;  %6026 = vpow2.f32 %v4280_v46  ;;  %v7852_v46 = vld [vmem:[#allocation100_spill] sm:$0xff] }
 0x1af   :  { %5495 = vst [vmem:[#allocation8 + $0x688] sm:$0xff] %v6229_v26  ;;  %5496 = vst [vmem:[#allocation8 + $0x690] sm:$0xff] %v6229_v26  ;;  %6028 = vpow2.f32 %v4310_v50 }
 0x1b0   :  { %5497 = vst [vmem:[#allocation8 + $0x698] sm:$0xff] %v6229_v26  ;;  %5498 = vst [vmem:[#allocation8 + $0x6a0] sm:$0xff] %v6229_v26 }
 0x1b1   :  { %5499 = vst [vmem:[#allocation8 + $0x6a8] sm:$0xff] %v6229_v26  ;;  %5500 = vst [vmem:[#allocation8 + $0x6b0] sm:$0xff] %v6229_v26 }
 0x1b2   :  { %5501 = vst [vmem:[#allocation8 + $0x6b8] sm:$0xff] %v6229_v26  ;;  %5503 = vst [vmem:[#allocation8 + $0x6c8] sm:$0xff] %v6230_v44  ;;  %v5999_v26 = vpop.eup %5998 }
 0x1b3   :  { %5504 = vst [vmem:[#allocation8 + $0x6d0] sm:$0xff] %v6230_v44  ;;  %5505 = vst [vmem:[#allocation8 + $0x6d8] sm:$0xff] %v6230_v44  ;;  %v6001_v1 = vpop.eup %6000  ;;  %v5078_v56 = vpack.c.bf16 %v5999_v26, %v5997_v42  ;;  %v7849_v42 = vld [vmem:[#allocation85_spill] sm:$0xff] }
 0x1b4   :  { %5506 = vst [vmem:[#allocation8 + $0x6e0] sm:$0xff] %v6230_v44  ;;  %5507 = vst [vmem:[#allocation8 + $0x6e8] sm:$0xff] %v6230_v44  ;;  %v6003_v37 = vpop.eup %6002 }
 0x1b5   :  { %5508 = vst [vmem:[#allocation8 + $0x6f0] sm:$0xff] %v6230_v44  ;;  %5509 = vst [vmem:[#allocation8 + $0x6f8] sm:$0xff] %v6230_v44  ;;  %v7373_v44 = vmul.f32 -12.5, %v7827_v41 }
 0x1b6   :  { %5511 = vst [vmem:[#allocation8 + $0x708] sm:$0xff] %v6231_v38  ;;  %5512 = vst [vmem:[#allocation8 + $0x710] sm:$0xff] %v6231_v38 }
 0x1b7   :  { %5513 = vst [vmem:[#allocation8 + $0x718] sm:$0xff] %v6231_v38  ;;  %5514 = vst [vmem:[#allocation8 + $0x720] sm:$0xff] %v6231_v38 }
 0x1b8   :  { %5515 = vst [vmem:[#allocation8 + $0x728] sm:$0xff] %v6231_v38  ;;  %5516 = vst [vmem:[#allocation8 + $0x730] sm:$0xff] %v6231_v38 }
 0x1b9   :  { %5517 = vst [vmem:[#allocation8 + $0x738] sm:$0xff] %v6231_v38  ;;  %5422 = vst [vmem:[#allocation8 + $0x440] sm:$0xff] %v5022_v24  ;;  %v3014_v24 = vmul.f32 %v7826_v33, %v7825_v31  ;;  %v7828_v38 = vld [vmem:[#allocation129_spill] sm:$0xff]  ;;  %v3079_v31 = vmul.f32 %v7849_v42, %v7848_v35 }
 0x1ba   :  { %5519 = vst [vmem:[#allocation8 + $0x748] sm:$0xff] %v6232_v45  ;;  %5520 = vst [vmem:[#allocation8 + $0x750] sm:$0xff] %v6232_v45  ;;  %v7868_v35 = vld [vmem:[#allocation145_spill] sm:$0xff] }
 0x1bb   :  { %5521 = vst [vmem:[#allocation8 + $0x758] sm:$0xff] %v6232_v45  ;;  %5522 = vst [vmem:[#allocation8 + $0x760] sm:$0xff] %v6232_v45  ;;  %v4342_v3 = vmul.f32 1.442695, %v3014_v24  ;;  %v7869_v42 = vld [vmem:[#allocation93_spill] sm:$0xff] }
 0x1bc   :  { %5523 = vst [vmem:[#allocation8 + $0x768] sm:$0xff] %v6232_v45  ;;  %5524 = vst [vmem:[#allocation8 + $0x770] sm:$0xff] %v6232_v45 }
 0x1bd   :  { %5525 = vst [vmem:[#allocation8 + $0x778] sm:$0xff] %v6232_v45  ;;  %5527 = vst [vmem:[#allocation8 + $0x788] sm:$0xff] %v6233_v30  ;;  %v7830_v45 = vld [vmem:[#allocation130_spill] sm:$0xff] }
 0x1be   :  { %5528 = vst [vmem:[#allocation8 + $0x790] sm:$0xff] %v6233_v30  ;;  %5529 = vst [vmem:[#allocation8 + $0x798] sm:$0xff] %v6233_v30 }
 0x1bf   :  { %5530 = vst [vmem:[#allocation8 + $0x7a0] sm:$0xff] %v6233_v30  ;;  %5531 = vst [vmem:[#allocation8 + $0x7a8] sm:$0xff] %v6233_v30 }
 0x1c0   :  { %5532 = vst [vmem:[#allocation8 + $0x7b0] sm:$0xff] %v6233_v30  ;;  %5533 = vst [vmem:[#allocation8 + $0x7b8] sm:$0xff] %v6233_v30  ;;  %v7831_v30 = vld [vmem:[#allocation78_spill] sm:$0xff] }
 0x1c1   :  { %5535 = vst [vmem:[#allocation8 + $0x7c8] sm:$0xff] %v6234_v49  ;;  %5536 = vst [vmem:[#allocation8 + $0x7d0] sm:$0xff] %v6234_v49 }
 0x1c2   :  { %5537 = vst [vmem:[#allocation8 + $0x7d8] sm:$0xff] %v6234_v49  ;;  %5538 = vst [vmem:[#allocation8 + $0x7e0] sm:$0xff] %v6234_v49 }
 0x1c3   :  { %5539 = vst [vmem:[#allocation8 + $0x7e8] sm:$0xff] %v6234_v49  ;;  %5540 = vst [vmem:[#allocation8 + $0x7f0] sm:$0xff] %v6234_v49 }
 0x1c4   :  { %5541 = vst [vmem:[#allocation8 + $0x7f8] sm:$0xff] %v6234_v49  ;;  %5543 = vst [vmem:[#allocation8 + $0x808] sm:$0xff] %v6235_v52  ;;  %v3030_v49 = vmul.f32 %v7831_v30, %v7830_v45  ;;  %v7853_v45 = vld [vmem:[#allocation139_spill] sm:$0xff] }
 0x1c5   :  { %5544 = vst [vmem:[#allocation8 + $0x810] sm:$0xff] %v6235_v52  ;;  %5545 = vst [vmem:[#allocation8 + $0x818] sm:$0xff] %v6235_v52  ;;  %v7854_v30 = vld [vmem:[#allocation87_spill] sm:$0xff] }
 0x1c6   :  { %5546 = vst [vmem:[#allocation8 + $0x820] sm:$0xff] %v6235_v52  ;;  %5547 = vst [vmem:[#allocation8 + $0x828] sm:$0xff] %v6235_v52  ;;  %v4374_v36 = vmul.f32 1.442695, %v3030_v49  ;;  %v3095_v49 = vmul.f32 %v7854_v30, %v7853_v45  ;;  %v3159_v45 = vmul.f32 %v7827_v41, %v7373_v44  ;;  %v3190_v41 = vmul.f32 %v7842_v32, %v7394_v20  ;;  %v7873_v20 = vld [vmem:[#allocation107_spill] sm:$0xff] }
 0x1c7   :  { %5548 = vst [vmem:[#allocation8 + $0x830] sm:$0xff] %v6235_v52  ;;  %5549 = vst [vmem:[#allocation8 + $0x838] sm:$0xff] %v6235_v52  ;;  %v7832_v52 = vld [vmem:[#allocation96_spill] sm:$0xff] }
 0x1c8   :  { %5551 = vst [vmem:[#allocation8 + $0x848] sm:$0xff] %v6236_v53  ;;  %5552 = vst [vmem:[#allocation8 + $0x850] sm:$0xff] %v6236_v53 }
 0x1c9   :  { %5553 = vst [vmem:[#allocation8 + $0x858] sm:$0xff] %v6236_v53  ;;  %5554 = vst [vmem:[#allocation8 + $0x860] sm:$0xff] %v6236_v53 }
 0x1ca   :  { %5555 = vst [vmem:[#allocation8 + $0x868] sm:$0xff] %v6236_v53  ;;  %5556 = vst [vmem:[#allocation8 + $0x870] sm:$0xff] %v6236_v53 }
 0x1cb   :  { %5557 = vst [vmem:[#allocation8 + $0x878] sm:$0xff] %v6236_v53  ;;  %5430 = vst [vmem:[#allocation8 + $0x480] sm:$0xff] %v5030_v27  ;;  %v3015_v27 = vmul.f32 %v7829_v48, %v7828_v38  ;;  %v7380_v53 = vmul.f32 -12.5, %v7832_v52 }
 0x1cc   :  { %5559 = vst [vmem:[#allocation8 + $0x888] sm:$0xff] %v6237_v47  ;;  %5560 = vst [vmem:[#allocation8 + $0x890] sm:$0xff] %v6237_v47 }
 0x1cd   :  { %5561 = vst [vmem:[#allocation8 + $0x898] sm:$0xff] %v6237_v47  ;;  %5562 = vst [vmem:[#allocation8 + $0x8a0] sm:$0xff] %v6237_v47  ;;  %v4344_v17 = vmul.f32 1.442695, %v3015_v27 }
 0x1ce   :  { %5563 = vst [vmem:[#allocation8 + $0x8a8] sm:$0xff] %v6237_v47  ;;  %5564 = vst [vmem:[#allocation8 + $0x8b0] sm:$0xff] %v6237_v47 }
 0x1cf   :  { %5565 = vst [vmem:[#allocation8 + $0x8b8] sm:$0xff] %v6237_v47  ;;  %5567 = vst [vmem:[#allocation8 + $0x8c8] sm:$0xff] %v6238_v9 }
 0x1d0   :  { %5568 = vst [vmem:[#allocation8 + $0x8d0] sm:$0xff] %v6238_v9  ;;  %5569 = vst [vmem:[#allocation8 + $0x8d8] sm:$0xff] %v6238_v9 }
 0x1d1   :  { %5570 = vst [vmem:[#allocation8 + $0x8e0] sm:$0xff] %v6238_v9  ;;  %5571 = vst [vmem:[#allocation8 + $0x8e8] sm:$0xff] %v6238_v9 }
 0x1d2   :  { %5572 = vst [vmem:[#allocation8 + $0x8f0] sm:$0xff] %v6238_v9  ;;  %5573 = vst [vmem:[#allocation8 + $0x8f8] sm:$0xff] %v6238_v9  ;;  %v4312_v9 = vmul.f32 1.442695, %v2999_v8  ;;  %v7401_v8 = vmul.f32 -12.5, %v7847_v7 }
 0x1d3   :  { %5575 = vst [vmem:[#allocation8 + $0x908] sm:$0xff] %v6239_v6  ;;  %5576 = vst [vmem:[#allocation8 + $0x910] sm:$0xff] %v6239_v6 }
 0x1d4   :  { %5577 = vst [vmem:[#allocation8 + $0x918] sm:$0xff] %v6239_v6  ;;  %5578 = vst [vmem:[#allocation8 + $0x920] sm:$0xff] %v6239_v6  ;;  %6030 = vpow2.f32 %v4312_v9 }
 0x1d5   :  { %5579 = vst [vmem:[#allocation8 + $0x928] sm:$0xff] %v6239_v6  ;;  %5580 = vst [vmem:[#allocation8 + $0x930] sm:$0xff] %v6239_v6  ;;  %6032 = vpow2.f32 %v4342_v3  ;;  %v7859_v3 = vld [vmem:[#allocation89_spill] sm:$0xff] }
 0x1d6   :  { %5581 = vst [vmem:[#allocation8 + $0x938] sm:$0xff] %v6239_v6  ;;  %5583 = vst [vmem:[#allocation8 + $0x948] sm:$0xff] %v6240_v2  ;;  %v6005_v6 = vpop.eup %6004  ;;  %6034 = vpow2.f32 %v4344_v17 }
 0x1d7   :  { %5584 = vst [vmem:[#allocation8 + $0x950] sm:$0xff] %v6240_v2  ;;  %5585 = vst [vmem:[#allocation8 + $0x958] sm:$0xff] %v6240_v2  ;;  %6036 = vpow2.f32 %v4374_v36 }
 0x1d8   :  { %5586 = vst [vmem:[#allocation8 + $0x960] sm:$0xff] %v6240_v2  ;;  %5587 = vst [vmem:[#allocation8 + $0x968] sm:$0xff] %v6240_v2 }
 0x1d9   :  { %5588 = vst [vmem:[#allocation8 + $0x970] sm:$0xff] %v6240_v2  ;;  %5589 = vst [vmem:[#allocation8 + $0x978] sm:$0xff] %v6240_v2  ;;  %v7836_v2 = vld [vmem:[#allocation80_spill] sm:$0xff] }
 0x1da   :  { %5591 = vst [vmem:[#allocation8 + $0x988] sm:$0xff] %v6241_v39  ;;  %5592 = vst [vmem:[#allocation8 + $0x990] sm:$0xff] %v6241_v39 }
 0x1db   :  { %5593 = vst [vmem:[#allocation8 + $0x998] sm:$0xff] %v6241_v39  ;;  %5594 = vst [vmem:[#allocation8 + $0x9a0] sm:$0xff] %v6241_v39 }
 0x1dc   :  { %5595 = vst [vmem:[#allocation8 + $0x9a8] sm:$0xff] %v6241_v39  ;;  %5596 = vst [vmem:[#allocation8 + $0x9b0] sm:$0xff] %v6241_v39 }
 0x1dd   :  { %5597 = vst [vmem:[#allocation8 + $0x9b8] sm:$0xff] %v6241_v39  ;;  %5438 = vst [vmem:[#allocation8 + $0x4c0] sm:$0xff] %v5038_v4  ;;  %v7834_v4 = vld [vmem:[#allocation79_spill] sm:$0xff]  ;;  %v3046_v39 = vmul.f32 %v7836_v2, %v7835_v40  ;;  %v7857_v40 = vld [vmem:[#allocation101_spill] sm:$0xff] }
 0x1de   :  { %5599 = vst [vmem:[#allocation8 + $0x9c8] sm:$0xff] %v6242_v13  ;;  %5600 = vst [vmem:[#allocation8 + $0x9d0] sm:$0xff] %v6242_v13  ;;  %v3031_v47 = vmul.f32 %v7834_v4, %v7833_v63  ;;  %v7856_v63 = vld [vmem:[#allocation88_spill] sm:$0xff]  ;;  %v7415_v2 = vmul.f32 -12.5, %v7857_v40 }
 0x1df   :  { %5601 = vst [vmem:[#allocation8 + $0x9d8] sm:$0xff] %v6242_v13  ;;  %5602 = vst [vmem:[#allocation8 + $0x9e0] sm:$0xff] %v6242_v13 }
 0x1e0   :  { %5603 = vst [vmem:[#allocation8 + $0x9e8] sm:$0xff] %v6242_v13  ;;  %5604 = vst [vmem:[#allocation8 + $0x9f0] sm:$0xff] %v6242_v13  ;;  %v4376_v5 = vmul.f32 1.442695, %v3031_v47 }
 0x1e1   :  { %5605 = vst [vmem:[#allocation8 + $0x9f8] sm:$0xff] %v6242_v13  ;;  %5607 = vst [vmem:[#allocation8 + $0xa08] sm:$0xff] %v6243_v14  ;;  %v6007_v13 = vpop.eup %6006 }
 0x1e2   :  { %5608 = vst [vmem:[#allocation8 + $0xa10] sm:$0xff] %v6243_v14  ;;  %5609 = vst [vmem:[#allocation8 + $0xa18] sm:$0xff] %v6243_v14  ;;  %v5094_v25 = vpack.c.bf16 %v6007_v13, %v6005_v6  ;;  %6038 = vpow2.f32 %v4376_v5  ;;  %v4472_v13 = vmul.f32 1.442695, %v3079_v31  ;;  %v7865_v5 = vld [vmem:[#allocation144_spill] sm:$0xff]  ;;  %v3143_v31 = vmul.f32 %v7869_v42, %v7868_v35 }
 0x1e3   :  { %5610 = vst [vmem:[#allocation8 + $0xa20] sm:$0xff] %v6243_v14  ;;  %5611 = vst [vmem:[#allocation8 + $0xa28] sm:$0xff] %v6243_v14 }
 0x1e4   :  { %5612 = vst [vmem:[#allocation8 + $0xa30] sm:$0xff] %v6243_v14  ;;  %5613 = vst [vmem:[#allocation8 + $0xa38] sm:$0xff] %v6243_v14  ;;  %v7837_v14 = vld [vmem:[#allocation97_spill] sm:$0xff] }
 0x1e5   :  { %5615 = vst [vmem:[#allocation8 + $0xa48] sm:$0xff] %v6244_v51  ;;  %5616 = vst [vmem:[#allocation8 + $0xa50] sm:$0xff] %v6244_v51 }
 0x1e6   :  { %5617 = vst [vmem:[#allocation8 + $0xa58] sm:$0xff] %v6244_v51  ;;  %5618 = vst [vmem:[#allocation8 + $0xa60] sm:$0xff] %v6244_v51 }
 0x1e7   :  { %5619 = vst [vmem:[#allocation8 + $0xa68] sm:$0xff] %v6244_v51  ;;  %5620 = vst [vmem:[#allocation8 + $0xa70] sm:$0xff] %v6244_v51 }
 0x1e8   :  { %5621 = vst [vmem:[#allocation8 + $0xa78] sm:$0xff] %v6244_v51  ;;  %5623 = vst [vmem:[#allocation8 + $0xa88] sm:$0xff] %v6245_v29  ;;  %v7387_v51 = vmul.f32 -12.5, %v7837_v14 }
 0x1e9   :  { %5624 = vst [vmem:[#allocation8 + $0xa90] sm:$0xff] %v6245_v29  ;;  %5625 = vst [vmem:[#allocation8 + $0xa98] sm:$0xff] %v6245_v29 }
 0x1ea   :  { %5626 = vst [vmem:[#allocation8 + $0xaa0] sm:$0xff] %v6245_v29  ;;  %5627 = vst [vmem:[#allocation8 + $0xaa8] sm:$0xff] %v6245_v29 }
 0x1eb   :  { %5628 = vst [vmem:[#allocation8 + $0xab0] sm:$0xff] %v6245_v29  ;;  %5629 = vst [vmem:[#allocation8 + $0xab8] sm:$0xff] %v6245_v29  ;;  %v7839_v29 = vld [vmem:[#allocation81_spill] sm:$0xff] }
 0x1ec   :  { %5631 = vst [vmem:[#allocation8 + $0xac8] sm:$0xff] %v6246_v16  ;;  %5632 = vst [vmem:[#allocation8 + $0xad0] sm:$0xff] %v6246_v16 }
 0x1ed   :  { %5633 = vst [vmem:[#allocation8 + $0xad8] sm:$0xff] %v6246_v16  ;;  %5634 = vst [vmem:[#allocation8 + $0xae0] sm:$0xff] %v6246_v16 }
 0x1ee   :  { %5635 = vst [vmem:[#allocation8 + $0xae8] sm:$0xff] %v6246_v16  ;;  %5636 = vst [vmem:[#allocation8 + $0xaf0] sm:$0xff] %v6246_v16 }
 0x1ef   :  { %5637 = vst [vmem:[#allocation8 + $0xaf8] sm:$0xff] %v6246_v16  ;;  %5446 = vst [vmem:[#allocation8 + $0x500] sm:$0xff] %v5046_v55  ;;  %v5086_v55 = vpack.c.bf16 %v6003_v37, %v6001_v1  ;;  %v3047_v16 = vmul.f32 %v7839_v29, %v7838_v15  ;;  %v7408_v1 = vmul.f32 -12.5, %v7852_v46  ;;  %v7855_v37 = vld [vmem:[#allocation140_spill] sm:$0xff]  ;;  %v7860_v29 = vld [vmem:[#allocation142_spill] sm:$0xff] }
 0x1f0   :  { %5639 = vst [vmem:[#allocation8 + $0xb08] sm:$0xff] %v6247_v18  ;;  %5640 = vst [vmem:[#allocation8 + $0xb10] sm:$0xff] %v6247_v18  ;;  %v3110_v4 = vmul.f32 %v7856_v63, %v7855_v37 }
 0x1f1   :  { %5641 = vst [vmem:[#allocation8 + $0xb18] sm:$0xff] %v6247_v18  ;;  %5642 = vst [vmem:[#allocation8 + $0xb20] sm:$0xff] %v6247_v18  ;;  %v4408_v33 = vmul.f32 1.442695, %v3047_v16  ;;  %v7861_v16 = vld [vmem:[#allocation90_spill] sm:$0xff] }
 0x1f2   :  { %5643 = vst [vmem:[#allocation8 + $0xb28] sm:$0xff] %v6247_v18  ;;  %5644 = vst [vmem:[#allocation8 + $0xb30] sm:$0xff] %v6247_v18  ;;  %v3126_v17 = vmul.f32 %v7861_v16, %v7860_v29  ;;  %v2455_v29 = vmul.f32 -12.5, %v7873_v20  ;;  %v3207_v16 = vmul.f32 %v7857_v40, %v7415_v2 }
 0x1f3   :  { %5645 = vst [vmem:[#allocation8 + $0xb38] sm:$0xff] %v6247_v18  ;;  %5647 = vst [vmem:[#allocation8 + $0xb48] sm:$0xff] %v6248_v19  ;;  %v7840_v18 = vld [vmem:[#allocation134_spill] sm:$0xff] }
 0x1f4   :  { %5648 = vst [vmem:[#allocation8 + $0xb50] sm:$0xff] %v6248_v19  ;;  %5649 = vst [vmem:[#allocation8 + $0xb58] sm:$0xff] %v6248_v19 }
 0x1f5   :  { %5650 = vst [vmem:[#allocation8 + $0xb60] sm:$0xff] %v6248_v19  ;;  %5651 = vst [vmem:[#allocation8 + $0xb68] sm:$0xff] %v6248_v19 }
 0x1f6   :  { %5652 = vst [vmem:[#allocation8 + $0xb70] sm:$0xff] %v6248_v19  ;;  %5653 = vst [vmem:[#allocation8 + $0xb78] sm:$0xff] %v6248_v19  ;;  %v7841_v19 = vld [vmem:[#allocation82_spill] sm:$0xff] }
 0x1f7   :  { %5655 = vst [vmem:[#allocation8 + $0xb88] sm:$0xff] %v6249_v11  ;;  %5656 = vst [vmem:[#allocation8 + $0xb90] sm:$0xff] %v6249_v11 }
 0x1f8   :  { %5657 = vst [vmem:[#allocation8 + $0xb98] sm:$0xff] %v6249_v11  ;;  %5658 = vst [vmem:[#allocation8 + $0xba0] sm:$0xff] %v6249_v11 }
 0x1f9   :  { %5659 = vst [vmem:[#allocation8 + $0xba8] sm:$0xff] %v6249_v11  ;;  %5660 = vst [vmem:[#allocation8 + $0xbb0] sm:$0xff] %v6249_v11 }
 0x1fa   :  { %5661 = vst [vmem:[#allocation8 + $0xbb8] sm:$0xff] %v6249_v11  ;;  %5663 = vst [vmem:[#allocation8 + $0xbc8] sm:$0xff] %v6250_v60  ;;  %v3062_v11 = vmul.f32 %v7841_v19, %v7840_v18 }
 0x1fb   :  { %5664 = vst [vmem:[#allocation8 + $0xbd0] sm:$0xff] %v6250_v60  ;;  %5665 = vst [vmem:[#allocation8 + $0xbd8] sm:$0xff] %v6250_v60 }
 0x1fc   :  { %5666 = vst [vmem:[#allocation8 + $0xbe0] sm:$0xff] %v6250_v60  ;;  %5667 = vst [vmem:[#allocation8 + $0xbe8] sm:$0xff] %v6250_v60  ;;  %v4438_v38 = vmul.f32 1.442695, %v3062_v11  ;;  %v7862_v11 = vld [vmem:[#allocation102_spill] sm:$0xff] }
 0x1fd   :  { %5668 = vst [vmem:[#allocation8 + $0xbf0] sm:$0xff] %v6250_v60  ;;  %5669 = vst [vmem:[#allocation8 + $0xbf8] sm:$0xff] %v6250_v60  ;;  %v7843_v60 = vld [vmem:[#allocation135_spill] sm:$0xff]  ;;  %v2422_v36 = vmul.f32 -12.5, %v7862_v11 }
 0x1fe   :  { %5671 = vst [vmem:[#allocation8 + $0xc08] sm:$0xff] %v6251_v57  ;;  %5672 = vst [vmem:[#allocation8 + $0xc10] sm:$0xff] %v6251_v57 }
 0x1ff   :  { %5673 = vst [vmem:[#allocation8 + $0xc18] sm:$0xff] %v6251_v57  ;;  %5674 = vst [vmem:[#allocation8 + $0xc20] sm:$0xff] %v6251_v57 }
 0x200   :  { %5675 = vst [vmem:[#allocation8 + $0xc28] sm:$0xff] %v6251_v57  ;;  %5676 = vst [vmem:[#allocation8 + $0xc30] sm:$0xff] %v6251_v57 }
 0x201   :  { %5677 = vst [vmem:[#allocation8 + $0xc38] sm:$0xff] %v6251_v57  ;;  %5454 = vst [vmem:[#allocation8 + $0x540] sm:$0xff] %v5054_v34  ;;  %v6009_v34 = vpop.eup %6008  ;;  %v7844_v57 = vld [vmem:[#allocation83_spill] sm:$0xff] }
 0x202   :  { %5679 = vst [vmem:[#allocation8 + $0xc48] sm:$0xff] %v6252_v43  ;;  %5680 = vst [vmem:[#allocation8 + $0xc50] sm:$0xff] %v6252_v43  ;;  %v6011_v28 = vpop.eup %6010  ;;  %v3063_v21 = vmul.f32 %v7844_v57, %v7843_v60  ;;  %v4504_v57 = vmul.f32 1.442695, %v3095_v49 }
 0x203   :  { %5681 = vst [vmem:[#allocation8 + $0xc58] sm:$0xff] %v6252_v43  ;;  %5682 = vst [vmem:[#allocation8 + $0xc60] sm:$0xff] %v6252_v43  ;;  %v6013_v12 = vpop.eup %6012  ;;  %v5102_v22 = vpack.c.bf16 %v6011_v28, %v6009_v34  ;;  %v7864_v28 = vld [vmem:[#allocation91_spill] sm:$0xff] }
 0x204   :  { %5683 = vst [vmem:[#allocation8 + $0xc68] sm:$0xff] %v6252_v43  ;;  %5684 = vst [vmem:[#allocation8 + $0xc70] sm:$0xff] %v6252_v43  ;;  %v6015_v23 = vpop.eup %6014  ;;  %v4440_v50 = vmul.f32 1.442695, %v3063_v21 }
 0x205   :  { %5685 = vst [vmem:[#allocation8 + $0xc78] sm:$0xff] %v6252_v43  ;;  %5462 = vst [vmem:[#allocation8 + $0x580] sm:$0xff] %v5062_v62  ;;  %v3078_v62 = vmul.f32 %v7846_v58, %v7845_v54  ;;  %v4406_v43 = vmul.f32 1.442695, %v3046_v39  ;;  %v6017_v24 = vpop.eup %6016  ;;  %v5110_v48 = vpack.c.bf16 %v6015_v23, %v6013_v12  ;;  %v7858_v39 = vld [vmem:[#allocation141_spill] sm:$0xff]  ;;  %v7866_v12 = vld [vmem:[#allocation92_spill] sm:$0xff] }
 0x206   :  { %5470 = vst [vmem:[#allocation8 + $0x5c0] sm:$0xff] %v5070_v10  ;;  %5478 = vst [vmem:[#allocation8 + $0x600] sm:$0xff] %v5078_v56  ;;  %v7851_v10 = vld [vmem:[#allocation86_spill] sm:$0xff]  ;;  %v6019_v27 = vpop.eup %6018  ;;  %v3142_v54 = vmul.f32 %v7866_v12, %v7865_v5  ;;  %v4534_v58 = vmul.f32 1.442695, %v3110_v4  ;;  %v3175_v4 = vmul.f32 %v7837_v14, %v7387_v51  ;;  %v3206_v14 = vmul.f32 %v7852_v46, %v7408_v1  ;;  %v7874_v1 = vld [vmem:[#allocation108_spill] sm:$0xff] }
 0x207   :  { %5486 = vst [vmem:[#allocation8 + $0x640] sm:$0xff] %v5086_v55  ;;  %5494 = vst [vmem:[#allocation8 + $0x680] sm:$0xff] %v5094_v25  ;;  %v3094_v26 = vmul.f32 %v7851_v10, %v7850_v0  ;;  %v6021_v56 = vpop.eup %6020  ;;  %6040 = vpow2.f32 %v4406_v43  ;;  %v4470_v47 = vmul.f32 1.442695, %v3078_v62  ;;  %v5118_v9 = vpack.c.bf16 %v6019_v27, %v6017_v24  ;;  %v7863_v25 = vld [vmem:[#allocation143_spill] sm:$0xff] }
 0x208   :  { %5502 = vst [vmem:[#allocation8 + $0x6c0] sm:$0xff] %v5102_v22  ;;  %5510 = vst [vmem:[#allocation8 + $0x700] sm:$0xff] %v5110_v48  ;;  %v6023_v6 = vpop.eup %6022  ;;  %v3111_v55 = vmul.f32 %v7859_v3, %v7858_v39  ;;  %6042 = vpow2.f32 %v4408_v33  ;;  %v3127_v60 = vmul.f32 %v7864_v28, %v7863_v25  ;;  %v7867_v22 = vld [vmem:[#allocation103_spill] sm:$0xff]  ;;  %v3158_v0 = vmul.f32 %v7822_v59, %v7362_v61  ;;  %v7870_v48 = vld [vmem:[#allocation104_spill] sm:$0xff] }
 0x209   :  { %v6025_v15 = vpop.eup %6024  ;;  %6044 = vpow2.f32 %v4438_v38  ;;  %v4502_v34 = vmul.f32 1.442695, %v3094_v26  ;;  %v5126_v18 = vpack.c.bf16 %v6023_v6, %v6021_v56  ;;  %5518 = vst [vmem:[#allocation8 + $0x740] sm:$0xff] %v5118_v9  ;;  %v2423_v23 = vmul.f32 -12.5, %v7867_v22  ;;  %v7871_v61 = vld [vmem:[#allocation105_spill] sm:$0xff] }
 0x20a   :  { %v6027_v19 = vpop.eup %6026  ;;  %6046 = vpow2.f32 %v4440_v50  ;;  %v4536_v33 = vmul.f32 1.442695, %v3111_v55  ;;  %v4566_v10 = vmul.f32 1.442695, %v3126_v17  ;;  %v2438_v27 = vmul.f32 -12.5, %v7870_v48 }
 0x20b   :  { %v6029_v21 = vpop.eup %6028  ;;  %6048 = vpow2.f32 %v4470_v47  ;;  %v5134_v62 = vpack.c.bf16 %v6027_v19, %v6025_v15  ;;  %5526 = vst [vmem:[#allocation8 + $0x780] sm:$0xff] %v5126_v18  ;;  %v4568_v30 = vmul.f32 1.442695, %v3127_v60  ;;  %v3174_v50 = vmul.f32 %v7832_v52, %v7380_v53  ;;  %v7872_v53 = vld [vmem:[#allocation106_spill] sm:$0xff] }
 0x20c   :  { %v6031_v43 = vpop.eup %6030  ;;  %6050 = vpow2.f32 %v4472_v13  ;;  %v4598_v56 = vmul.f32 1.442695, %v3142_v54  ;;  %v2439_v63 = vmul.f32 -12.5, %v7871_v61  ;;  %v4600_v47 = vmul.f32 1.442695, %v3143_v31 }
 0x20d   :  { %v6033_v24 = vpop.eup %6032  ;;  %6052 = vpow2.f32 %v4502_v34  ;;  %v5142_v26 = vpack.c.bf16 %v6031_v43, %v6029_v21  ;;  %5534 = vst [vmem:[#allocation8 + $0x7c0] sm:$0xff] %v5134_v62  ;;  %v4630_v44 = vmul.f32 1.442695, %v3158_v0  ;;  %v2454_v39 = vmul.f32 -12.5, %v7872_v53 }
 0x20e   :  { %v6035_v38 = vpop.eup %6034  ;;  %6054 = vpow2.f32 %v4504_v57  ;;  %v3191_v3 = vmul.f32 %v7847_v7, %v7401_v8  ;;  %v4632_v55 = vmul.f32 1.442695, %v3159_v45  ;;  %v4662_v51 = vmul.f32 1.442695, %v3174_v50 }
 0x20f   :  { %v6037_v49 = vpop.eup %6036  ;;  %6056 = vpow2.f32 %v4534_v58  ;;  %v5150_v37 = vpack.c.bf16 %v6035_v38, %v6033_v24  ;;  %5542 = vst [vmem:[#allocation8 + $0x800] sm:$0xff] %v5142_v26  ;;  %v4664_v17 = vmul.f32 1.442695, %v3175_v4  ;;  %v3222_v7 = vmul.f32 %v7862_v11, %v2422_v36  ;;  %v7875_v11 = vld [vmem:[#allocation109_spill] sm:$0xff] }
 0x210   :  { %v6039_v59 = vpop.eup %6038  ;;  %6058 = vpow2.f32 %v4536_v33  ;;  %v4694_v8 = vmul.f32 1.442695, %v3190_v41  ;;  %v2470_v19 = vmul.f32 -12.5, %v7874_v1  ;;  %v3223_v25 = vmul.f32 %v7867_v22, %v2423_v23 }
 0x211   :  { %v6041_v9 = vpop.eup %6040  ;;  %6060 = vpow2.f32 %v4566_v10  ;;  %v5158_v6 = vpack.c.bf16 %v6039_v59, %v6037_v49  ;;  %5550 = vst [vmem:[#allocation8 + $0x840] sm:$0xff] %v5150_v37  ;;  %v4696_v28 = vmul.f32 1.442695, %v3191_v3  ;;  %v3238_v57 = vmul.f32 %v7870_v48, %v2438_v27 }
 0x212   :  { %v6043_v52 = vpop.eup %6042  ;;  %6062 = vpow2.f32 %v4568_v30  ;;  %v4726_v40 = vmul.f32 1.442695, %v3206_v14  ;;  %v2471_v36 = vmul.f32 -12.5, %v7875_v11  ;;  %v3239_v5 = vmul.f32 %v7871_v61, %v2439_v63 }
 0x213   :  { %v6045_v13 = vpop.eup %6044  ;;  %6064 = vpow2.f32 %v4598_v56  ;;  %v5166_v15 = vpack.c.bf16 %v6043_v52, %v6041_v9  ;;  %5558 = vst [vmem:[#allocation8 + $0x880] sm:$0xff] %v5158_v6  ;;  %v4728_v12 = vmul.f32 1.442695, %v3207_v16  ;;  %v3254_v58 = vmul.f32 %v7872_v53, %v2454_v39 }
 0x214   :  { %v6047_v32 = vpop.eup %6046  ;;  %6066 = vpow2.f32 %v4600_v47  ;;  %v4758_v62 = vmul.f32 1.442695, %v3222_v7  ;;  %v3255_v23 = vmul.f32 %v7873_v20, %v2455_v29  ;;  %v4760_v35 = vmul.f32 1.442695, %v3223_v25 }
 0x215   :  { %v6049_v34 = vpop.eup %6048  ;;  %6068 = vpow2.f32 %v4630_v44  ;;  %v5174_v18 = vpack.c.bf16 %v6047_v32, %v6045_v13  ;;  %5566 = vst [vmem:[#allocation8 + $0x8c0] sm:$0xff] %v5166_v15  ;;  %v3270_v31 = vmul.f32 %v7874_v1, %v2470_v19  ;;  %v4790_v33 = vmul.f32 1.442695, %v3238_v57 }
 0x216   :  { %v6051_v46 = vpop.eup %6050  ;;  %6070 = vpow2.f32 %v4632_v55  ;;  %v3271_v10 = vmul.f32 %v7875_v11, %v2471_v36  ;;  %v4792_v26 = vmul.f32 1.442695, %v3239_v5  ;;  %v4822_v48 = vmul.f32 1.442695, %v3254_v58 }
 0x217   :  { %v6053_v60 = vpop.eup %6052  ;;  %6072 = vpow2.f32 %v4662_v51  ;;  %v5182_v2 = vpack.c.bf16 %v6051_v46, %v6049_v34  ;;  %5574 = vst [vmem:[#allocation8 + $0x900] sm:$0xff] %v5174_v18  ;;  %v4824_v30 = vmul.f32 1.442695, %v3255_v23  ;;  %v4854_v50 = vmul.f32 1.442695, %v3270_v31 }
 0x218   :  { %v6055_v21 = vpop.eup %6054  ;;  %6074 = vpow2.f32 %v4664_v17  ;;  %v4856_v59 = vmul.f32 1.442695, %v3271_v10 }
 0x219   :  { %v6057_v54 = vpop.eup %6056  ;;  %6076 = vpow2.f32 %v4694_v8  ;;  %v5190_v43 = vpack.c.bf16 %v6055_v21, %v6053_v60  ;;  %5582 = vst [vmem:[#allocation8 + $0x940] sm:$0xff] %v5182_v2 }
 0x21a   :  { %v6059_v22 = vpop.eup %6058  ;;  %6078 = vpow2.f32 %v4696_v28 }
 0x21b   :  { %v6061_v42 = vpop.eup %6060  ;;  %6080 = vpow2.f32 %v4726_v40  ;;  %v5198_v24 = vpack.c.bf16 %v6059_v22, %v6057_v54  ;;  %5590 = vst [vmem:[#allocation8 + $0x980] sm:$0xff] %v5190_v43 }
 0x21c   :  { %v6063_v0 = vpop.eup %6062  ;;  %6082 = vpow2.f32 %v4728_v12 }
 0x21d   :  { %v6065_v38 = vpop.eup %6064  ;;  %6084 = vpow2.f32 %v4758_v62  ;;  %v5206_v27 = vpack.c.bf16 %v6063_v0, %v6061_v42  ;;  %5598 = vst [vmem:[#allocation8 + $0x9c0] sm:$0xff] %v5198_v24 }
 0x21e   :  { %v6067_v45 = vpop.eup %6066  ;;  %6086 = vpow2.f32 %v4760_v35 }
 0x21f   :  { %v6069_v49 = vpop.eup %6068  ;;  %6088 = vpow2.f32 %v4790_v33  ;;  %v5214_v56 = vpack.c.bf16 %v6067_v45, %v6065_v38  ;;  %5606 = vst [vmem:[#allocation8 + $0xa00] sm:$0xff] %v5206_v27 }
 0x220   :  { %v6071_v37 = vpop.eup %6070  ;;  %6090 = vpow2.f32 %v4792_v26 }
 0x221   :  { %v6073_v61 = vpop.eup %6072  ;;  %6092 = vpow2.f32 %v4822_v48  ;;  %v5222_v63 = vpack.c.bf16 %v6071_v37, %v6069_v49  ;;  %5614 = vst [vmem:[#allocation8 + $0xa40] sm:$0xff] %v5214_v56 }
 0x222   :  { %v6075_v4 = vpop.eup %6074  ;;  %6094 = vpow2.f32 %v4824_v30 }
 0x223   :  { %v6077_v47 = vpop.eup %6076  ;;  %6096 = vpow2.f32 %v4854_v50  ;;  %v5230_v9 = vpack.c.bf16 %v6075_v4, %v6073_v61  ;;  %5622 = vst [vmem:[#allocation8 + $0xa80] sm:$0xff] %v5222_v63 }
 0x224   :  { %v6079_v41 = vpop.eup %6078  ;;  %6098 = vpow2.f32 %v4856_v59 }
 0x225   :  { %v6081_v44 = vpop.eup %6080  ;;  %v5238_v6 = vpack.c.bf16 %v6079_v41, %v6077_v47  ;;  %5630 = vst [vmem:[#allocation8 + $0xac0] sm:$0xff] %v5230_v9 }
 0x226   :  { %v6083_v52 = vpop.eup %6082 }
 0x227   :  { %v6085_v53 = vpop.eup %6084  ;;  %v5246_v39 = vpack.c.bf16 %v6083_v52, %v6081_v44  ;;  %5638 = vst [vmem:[#allocation8 + $0xb00] sm:$0xff] %v5238_v6 }
 0x228   :  { %v6087_v3 = vpop.eup %6086 }
 0x229   :  { %v6089_v55 = vpop.eup %6088  ;;  %v5254_v13 = vpack.c.bf16 %v6087_v3, %v6085_v53  ;;  %5646 = vst [vmem:[#allocation8 + $0xb40] sm:$0xff] %v5246_v39 }
 0x22a   :  { %v6091_v14 = vpop.eup %6090 }
 0x22b   :  { %v6093_v51 = vpop.eup %6092  ;;  %v5262_v15 = vpack.c.bf16 %v6091_v14, %v6089_v55  ;;  %5654 = vst [vmem:[#allocation8 + $0xb80] sm:$0xff] %v5254_v13 }
 0x22c   :  { %v6095_v32 = vpop.eup %6094 }
 0x22d   :  { %v6097_v20 = vpop.eup %6096  ;;  %v5270_v29 = vpack.c.bf16 %v6095_v32, %v6093_v51  ;;  %5662 = vst [vmem:[#allocation8 + $0xbc0] sm:$0xff] %v5262_v15 }
 0x22e   :  { %v6099_v16 = vpop.eup %6098 }
 0x22f   :  { %v5278_v17 = vpack.c.bf16 %v6099_v16, %v6097_v20  ;;  %5670 = vst [vmem:[#allocation8 + $0xc00] sm:$0xff] %v5270_v29 }
 0x231   :  { %5678 = vst [vmem:[#allocation8 + $0xc40] sm:$0xff] %v5278_v17 }
 0x232   :  { %6177 = shalt.err (!%p6174_p0)
}
 0x233   :  { %s6178_s30 = scalar_lea.hbm %s7478_s4, 51200 }
 0x234   :  { %p6179_p1 = scmp.ne.s32.totalorder %s7478_s4, %s6178_s30  ;;  %p6182_p2 = scmp.lt.u32.totalorder %s6178_s30, %s7478_s4 }
 0x236   :  { %p6184_p3 = pnand %p6182_p2, %p6179_p1 }
 0x238   :  { %6187 = shalt.err (!%p6184_p3)
}
 0x239   :  { %5721 = dma.vmem_to_hbm [thread:$0]  %s5716_s28, 51200, %s7478_s4, [#allocation7], %s6201_s15, %s6201_s15, %s6202_s16  }
 0x23a   :  { %6190 = dma.done.wait [#allocation4], 2048  }
 0x23b   :  { %6191 = vsyncadd [#allocation4], 4294965248 }
 0x23c   :  { %6192 = dma.done.wait [#allocation7], 51712  }
 0x23d   :  { %6193 = vsyncadd [#allocation7], 4294915584 }
 0x23e   :  { %5731 = vsyncpa [#allocation3], 1 }
 0x23f   :  { %5732 = vsyncpa [#allocation4], 1 }
 0x240   :  { %5733 = vsyncpa [#allocation7], 1 }

</bundles_post_ra>
